<compile_context>
chip_gen: v7x
topology: tpu7x:2x2x1
jax: 0.10.0
libtpu: 0.0.40
codegen_flags: <defaults>
</compile_context>

<pallas_src>
import jax
import jax.numpy as jnp
from jax.experimental import pallas as pl
from jax.experimental.pallas import tpu as pltpu


def _round_up(n, m):
    return (n + m - 1) // m * m


# ----------------------------- Pallas kernel --------------------------------
def ddim_forward_kernel(
    x_ref,      # (Bm, D)   clean image tile, flattened, bf16
    noise_ref,  # (Bm, D)   gaussian noise tile, f32 (MSE target stays f32)
    scl_ref,    # (Bm, 3)   [sqrt(ab_t), sqrt(1-ab_t), row-valid mask], f32
    emb_ref,    # (Bm, 2E)  [time-embedding | label-embedding], f32
    w1x_ref,    # (D, H)    first-layer weight, image part, bf16
    w1e_ref,    # (2E, H)   first-layer weight, embedding part, bf16
    b1_ref,     # (1, H)    f32
    w2_ref,     # (H, D)    bf16
    b2_ref,     # (1, D)    f32
    loss_ref,   # (1, 1)    per-parallel-slice sum of squared error, f32
    acc_ref,    # (8, D)    VMEM partial-sum accumulator, f32
):
    i = pl.program_id(1)                       # reduction step within this slice

    @pl.when(i == 0)
    def _init():
        acc_ref[...] = jnp.zeros_like(acc_ref)

    x = x_ref[...].astype(jnp.float32)
    noise = noise_ref[...]
    scl = scl_ref[...]
    sab = scl[:, 0:1]
    s1ab = scl[:, 1:2]
    mask = scl[:, 2:3]

    # --- forward diffusion (add_noise), f32 elementwise ----------------------
    noisy = sab * x + s1ab * noise                          # (Bm, D)

    # --- noise-prediction network: two accumulated dots (no concat copy) -----
    h = jnp.dot(noisy.astype(jnp.bfloat16), w1x_ref[...],
                preferred_element_type=jnp.float32)
    h = h + jnp.dot(emb_ref[...].astype(jnp.bfloat16), w1e_ref[...],
                    preferred_element_type=jnp.float32)
    h = jnp.maximum(h + b1_ref[...], 0.0)                   # (Bm, H) f32

    est = jnp.dot(h.astype(jnp.bfloat16), w2_ref[...],
                  preferred_element_type=jnp.float32) + b2_ref[...]

    # --- masked squared error: per-lane partial sums (VPU), reduce once ------
    diff = (est - noise) * mask
    sq = diff * diff                                        # (Bm, D) f32
    bm, d = sq.shape
    acc_ref[...] = acc_ref[...] + sq.reshape(bm // 8, 8, d).sum(axis=0)

    @pl.when(i == pl.num_programs(1) - 1)
    def _finalize():
        loss_ref[...] = jnp.sum(acc_ref[...], keepdims=True)


def ddim_forward(x_flat, noise, sqrt_ab, sqrt_1mab, emb, params):
    """x_flat, noise: (B, D) f32; emb: (B, 2E) f32. Returns scalar MSE loss."""
    B, D = x_flat.shape
    E2 = emb.shape[1]
    H = params["w1x"].shape[1]

    # batch tile: large tiles amortize per-step pipeline overhead; bf16 input
    # tiles need the sublane (row) dim to be a multiple of 16.
    if B >= 1024:
        Bm = 512
    elif B >= 256:
        Bm = 256
    else:
        Bm = _round_up(B, 16)

    # leading parallel axis: shards the batch across TensorCores on v7x.
    P = 2 if B >= 2 * Bm else 1
    B_pad = _round_up(B, P * Bm)
    G = B_pad // (P * Bm)
    pad = B_pad - B

    x_bf16 = x_flat.astype(jnp.bfloat16)
    if pad:
        x_bf16 = jnp.pad(x_bf16, ((0, pad), (0, 0)))
        noise = jnp.pad(noise, ((0, pad), (0, 0)))
        emb = jnp.pad(emb, ((0, pad), (0, 0)))
        sqrt_ab = jnp.pad(sqrt_ab, ((0, pad), (0, 0)))
        sqrt_1mab = jnp.pad(sqrt_1mab, ((0, pad), (0, 0)))
    mask = (jnp.arange(B_pad, dtype=jnp.int32) < B).astype(jnp.float32)[:, None]
    scl = jnp.concatenate([sqrt_ab, sqrt_1mab, mask], axis=1)   # (B_pad, 3)

    sse = pl.pallas_call(
        ddim_forward_kernel,
        out_shape=jax.ShapeDtypeStruct((P, 1), jnp.float32),
        grid=(P, G),
        in_specs=[
            pl.BlockSpec((Bm, D), lambda p, i: (p * G + i, 0)),   # x (bf16)
            pl.BlockSpec((Bm, D), lambda p, i: (p * G + i, 0)),   # noise (f32)
            pl.BlockSpec((Bm, 3), lambda p, i: (p * G + i, 0)),   # scales+mask
            pl.BlockSpec((Bm, E2), lambda p, i: (p * G + i, 0)),  # embeddings
            # weights: constant index_map -> VMEM-resident across the grid
            pl.BlockSpec((D, H), lambda p, i: (0, 0)),            # w1x
            pl.BlockSpec((E2, H), lambda p, i: (0, 0)),           # w1e
            pl.BlockSpec((1, H), lambda p, i: (0, 0)),            # b1
            pl.BlockSpec((H, D), lambda p, i: (0, 0)),            # w2
            pl.BlockSpec((1, D), lambda p, i: (0, 0)),            # b2
        ],
        out_specs=pl.BlockSpec((1, 1), lambda p, i: (p, 0)),
        scratch_shapes=[pltpu.VMEM((8, D), jnp.float32)],
        compiler_params=pltpu.CompilerParams(
            # p shards across cores (v7x); i accumulates -> reduction axis
            dimension_semantics=("parallel", "arbitrary"),
            # headroom for Bm=512 tiles on v5e's 16 MiB default scoped VMEM
            vmem_limit_bytes=48 * 1024 * 1024),
    )(x_bf16, noise, scl, emb,
      params["w1x"], params["w1e"], params["b1"], params["w2"], params["b2"])

    return jnp.sum(sse) / jnp.float32(B * D)   # finalize mean (F.mse_loss)


# ------------------------------- glue / setup --------------------------------
def make_variance_scheduler(beta_start=1e-4, beta_end=0.02, num_steps=1000):
    betas = jnp.linspace(beta_start, beta_end, num_steps, dtype=jnp.float32)
    alphas = 1.0 - betas
    alpha_bars = jnp.cumprod(alphas)
    return betas, alphas, alpha_bars


def make_network_params(key, D, E, H, num_steps, num_classes):
    ks = jax.random.split(key, 5)
    s1 = 1.0 / jnp.sqrt(jnp.float32(D + 2 * E))
    s2 = 1.0 / jnp.sqrt(jnp.float32(H))
    return {
        "t_table": jax.random.normal(ks[0], (num_steps, E), jnp.float32) * 0.02,
        "l_table": jax.random.normal(ks[1], (num_classes, E), jnp.float32) * 0.02,
        # first-layer weight split into image / embedding parts, bf16
        "w1x": (jax.random.normal(ks[2], (D, H), jnp.float32) * s1).astype(jnp.bfloat16),
        "w1e": (jax.random.normal(ks[3], (2 * E, H), jnp.float32) * s1).astype(jnp.bfloat16),
        "b1": jnp.zeros((1, H), jnp.float32),
        "w2": (jax.random.normal(ks[4], (H, D), jnp.float32) * s2).astype(jnp.bfloat16),
        "b2": jnp.zeros((1, D), jnp.float32),
    }


def ddim_loss(x_nchw, label, key, params, alpha_bars, num_steps):
    """Mirrors DDIM.forward: returns (kernel loss, pure-JAX reference loss)."""
    B, C, Hh, Ww = x_nchw.shape
    D = C * Hh * Ww
    k_t, k_n = jax.random.split(key)

    # 1. random timesteps per batch element (torch.randint equivalent)
    t = jax.random.randint(k_t, (B,), 0, num_steps)

    # 2. gaussian noise (torch.randn_like equivalent)
    noise = jax.random.normal(k_n, (B, D), jnp.float32)

    ab_t = alpha_bars[t].reshape(B, 1)
    sqrt_ab = jnp.sqrt(ab_t)
    sqrt_1mab = jnp.sqrt(1.0 - ab_t)

    # embedding gathers (glue, outside the kernel)
    t_emb = jnp.take(params["t_table"], t, axis=0)
    l_emb = jnp.take(params["l_table"], label, axis=0)
    emb = jnp.concatenate([t_emb, l_emb], axis=1)        # (B, 2E)

    x_flat = x_nchw.reshape(B, D).astype(jnp.float32)
    loss = ddim_forward(x_flat, noise, sqrt_ab, sqrt_1mab, emb, params)

    # pure-JAX reference with identical bf16 cast points
    x_b = x_flat.astype(jnp.bfloat16).astype(jnp.float32)
    noisy = sqrt_ab * x_b + sqrt_1mab * noise
    h_ref = jnp.maximum(
        jnp.dot(noisy.astype(jnp.bfloat16), params["w1x"],
                preferred_element_type=jnp.float32)
        + jnp.dot(emb.astype(jnp.bfloat16), params["w1e"],
                  preferred_element_type=jnp.float32)
        + params["b1"], 0.0)
    est_ref = jnp.dot(h_ref.astype(jnp.bfloat16), params["w2"],
                      preferred_element_type=jnp.float32) + params["b2"]
    loss_ref = jnp.mean((est_ref - noise) ** 2)
    return loss, loss_ref


if __name__ == "__main__":
    key = jax.random.PRNGKey(0)
    k_param, k_x, k_lbl, k_fwd = jax.random.split(key, 4)

    # small shapes consistent with DDIM.generate_sample's (N, 1, 32, 32) images
    B, C, Himg, Wimg = 2, 1, 32, 32
    D = C * Himg * Wimg            # 1024
    E, HID = 64, 256               # 2E = 128, H fills 256-wide MXU N dim
    NUM_STEPS, NUM_CLASSES = 1000, 10

    _, _, alpha_bars = make_variance_scheduler(num_steps=NUM_STEPS)
    params = make_network_params(k_param, D, E, HID, NUM_STEPS, NUM_CLASSES)

    x = jax.random.normal(k_x, (B, C, Himg, Wimg), jnp.float32)
    label = jax.random.randint(k_lbl, (B,), 0, NUM_CLASSES)

    loss, loss_ref = ddim_loss(x, label, k_fwd, params, alpha_bars, NUM_STEPS)
    loss = jax.block_until_ready(loss)
    loss_ref = jax.block_until_ready(loss_ref)

    assert jnp.isfinite(loss), "kernel produced non-finite loss"
    assert jnp.allclose(loss, loss_ref, rtol=1e-3, atol=1e-5), (loss, loss_ref)
    print("KERNEL_OK")
</pallas_src>

<mosaic_0001>
module attributes {stable_mosaic.version = 11 : i64} {
  func.func @ddim_forward_kernel(%arg0: i32, %arg1: i32, %arg2: memref<16x1024xbf16, #tpu.memory_space<vmem>>, %arg3: memref<16x1024xf32, #tpu.memory_space<vmem>>, %arg4: memref<16x3xf32, #tpu.memory_space<vmem>>, %arg5: memref<16x128xf32, #tpu.memory_space<vmem>>, %arg6: memref<1024x256xbf16, #tpu.memory_space<vmem>>, %arg7: memref<128x256xbf16, #tpu.memory_space<vmem>>, %arg8: memref<1x256xf32, #tpu.memory_space<vmem>>, %arg9: memref<256x1024xbf16, #tpu.memory_space<vmem>>, %arg10: memref<1x1024xf32, #tpu.memory_space<vmem>>, %arg11: memref<1x1xf32, #tpu.memory_space<vmem>>, %arg12: memref<8x1024xf32, #tpu.memory_space<vmem>>) attributes {dimension_semantics = [#tpu.dimension_semantics<parallel>, #tpu.dimension_semantics<arbitrary>], iteration_bounds = array<i64: 1, 1>, scalar_prefetch = 0 : i64, scratch_operands = 1 : i64, tpu.core_type = #tpu.core_type<tc>, window_params = [{transform_indices = @transform_0, window_bounds = array<i64: 16, 1024>}, {transform_indices = @transform_1, window_bounds = array<i64: 16, 1024>}, {transform_indices = @transform_2, window_bounds = array<i64: 16, 3>}, {transform_indices = @transform_3, window_bounds = array<i64: 16, 128>}, {pipeline_mode = #tpu.pipeline_mode<synchronous>, transform_indices = @transform_4, window_bounds = array<i64: 1024, 256>}, {pipeline_mode = #tpu.pipeline_mode<synchronous>, transform_indices = @transform_5, window_bounds = array<i64: 128, 256>}, {pipeline_mode = #tpu.pipeline_mode<synchronous>, transform_indices = @transform_6, window_bounds = array<i64: 1, 256>}, {pipeline_mode = #tpu.pipeline_mode<synchronous>, transform_indices = @transform_7, window_bounds = array<i64: 256, 1024>}, {pipeline_mode = #tpu.pipeline_mode<synchronous>, transform_indices = @transform_8, window_bounds = array<i64: 1, 1024>}, {transform_indices = @transform_9, window_bounds = array<i64: 1, 1>}]} {
    %c0_i32 = arith.constant 0 : i32
    %0 = arith.cmpi eq, %arg1, %c0_i32 : i32
    %1 = arith.extui %0 : i1 to i32
    %c0_i32_0 = arith.constant 0 : i32
    %2 = arith.cmpi ne, %1, %c0_i32_0 : i32
    scf.if %2 {
      %cst_28 = arith.constant 0.000000e+00 : f32
      %46 = vector.broadcast %cst_28 : f32 to vector<8x1024xf32>
      %c0_29 = arith.constant 0 : index
      %c0_30 = arith.constant 0 : index
      %47 = vector.load %arg12[%c0_29, %c0_30] : memref<8x1024xf32, #tpu.memory_space<vmem>>, vector<8x1024xf32>
      tpu.vector_store %arg12[%c0_29, %c0_30], %46 {strides = array<i32>} : memref<8x1024xf32, #tpu.memory_space<vmem>>, vector<8x1024xf32>,
    } else {
    }
    %c0 = arith.constant 0 : index
    %c0_1 = arith.constant 0 : index
    %3 = vector.load %arg2[%c0, %c0_1] : memref<16x1024xbf16, #tpu.memory_space<vmem>>, vector<16x1024xbf16>
    %4 = arith.extf %3 : vector<16x1024xbf16> to vector<16x1024xf32>
    %c0_2 = arith.constant 0 : index
    %c0_3 = arith.constant 0 : index
    %5 = vector.load %arg3[%c0_2, %c0_3] : memref<16x1024xf32, #tpu.memory_space<vmem>>, vector<16x1024xf32>
    %c0_4 = arith.constant 0 : index
    %c0_5 = arith.constant 0 : index
    %6 = vector.load %arg4[%c0_4, %c0_5] : memref<16x3xf32, #tpu.memory_space<vmem>>, vector<16x3xf32>
    %7 = vector.extract_strided_slice %6 {offsets = [0, 0], sizes = [16, 1], strides = [1, 1]} : vector<16x3xf32> to vector<16x1xf32>
    %8 = vector.extract_strided_slice %6 {offsets = [0, 1], sizes = [16, 1], strides = [1, 1]} : vector<16x3xf32> to vector<16x1xf32>
    %9 = vector.extract_strided_slice %6 {offsets = [0, 2], sizes = [16, 1], strides = [1, 1]} : vector<16x3xf32> to vector<16x1xf32>
    %10 = vector.broadcast %7 : vector<16x1xf32> to vector<16x1024xf32>
    %11 = arith.mulf %10, %4 : vector<16x1024xf32>
    %12 = vector.broadcast %8 : vector<16x1xf32> to vector<16x1024xf32>
    %13 = arith.mulf %12, %5 : vector<16x1024xf32>
    %14 = arith.addf %11, %13 : vector<16x1024xf32>
    %15 = arith.truncf %14 : vector<16x1024xf32> to vector<16x1024xbf16>
    %c0_6 = arith.constant 0 : index
    %c0_7 = arith.constant 0 : index
    %16 = vector.load %arg6[%c0_6, %c0_7] : memref<1024x256xbf16, #tpu.memory_space<vmem>>, vector<1024x256xbf16>
    %cst = arith.constant dense<0.000000e+00> : vector<16x256xf32>
    %17 = tpu.matmul %15, %16, %cst {dimension_numbers = #tpu.dot_dimension_numbers<[1], [0], [0], [1], [0, 0, 1, 1], [], []>} : vector<16x1024xbf16>, vector<1024x256xbf16>, vector<16x256xf32> -> vector<16x256xf32>
    %c0_8 = arith.constant 0 : index
    %c0_9 = arith.constant 0 : index
    %18 = vector.load %arg5[%c0_8, %c0_9] : memref<16x128xf32, #tpu.memory_space<vmem>>, vector<16x128xf32>
    %19 = arith.truncf %18 : vector<16x128xf32> to vector<16x128xbf16>
    %c0_10 = arith.constant 0 : index
    %c0_11 = arith.constant 0 : index
    %20 = vector.load %arg7[%c0_10, %c0_11] : memref<128x256xbf16, #tpu.memory_space<vmem>>, vector<128x256xbf16>
    %cst_12 = arith.constant dense<0.000000e+00> : vector<16x256xf32>
    %21 = tpu.matmul %19, %20, %cst_12 {dimension_numbers = #tpu.dot_dimension_numbers<[1], [0], [0], [1], [0, 0, 1, 1], [], []>} : vector<16x128xbf16>, vector<128x256xbf16>, vector<16x256xf32> -> vector<16x256xf32>
    %22 = arith.addf %17, %21 : vector<16x256xf32>
    %c0_13 = arith.constant 0 : index
    %c0_14 = arith.constant 0 : index
    %23 = vector.load %arg8[%c0_13, %c0_14] : memref<1x256xf32, #tpu.memory_space<vmem>>, vector<1x256xf32>
    %24 = vector.broadcast %23 : vector<1x256xf32> to vector<16x256xf32>
    %25 = arith.addf %22, %24 : vector<16x256xf32>
    %cst_15 = arith.constant 0.000000e+00 : f32
    %26 = vector.broadcast %cst_15 : f32 to vector<16x256xf32>
    %27 = arith.maximumf %25, %26 : vector<16x256xf32>
    %28 = arith.truncf %27 : vector<16x256xf32> to vector<16x256xbf16>
    %c0_16 = arith.constant 0 : index
    %c0_17 = arith.constant 0 : index
    %29 = vector.load %arg9[%c0_16, %c0_17] : memref<256x1024xbf16, #tpu.memory_space<vmem>>, vector<256x1024xbf16>
    %cst_18 = arith.constant dense<0.000000e+00> : vector<16x1024xf32>
    %30 = tpu.matmul %28, %29, %cst_18 {dimension_numbers = #tpu.dot_dimension_numbers<[1], [0], [0], [1], [0, 0, 1, 1], [], []>} : vector<16x256xbf16>, vector<256x1024xbf16>, vector<16x1024xf32> -> vector<16x1024xf32>
    %c0_19 = arith.constant 0 : index
    %c0_20 = arith.constant 0 : index
    %31 = vector.load %arg10[%c0_19, %c0_20] : memref<1x1024xf32, #tpu.memory_space<vmem>>, vector<1x1024xf32>
    %32 = vector.broadcast %31 : vector<1x1024xf32> to vector<16x1024xf32>
    %33 = arith.addf %30, %32 : vector<16x1024xf32>
    %34 = arith.subf %33, %5 : vector<16x1024xf32>
    %35 = vector.broadcast %9 : vector<16x1xf32> to vector<16x1024xf32>
    %36 = arith.mulf %34, %35 : vector<16x1024xf32>
    %37 = arith.mulf %36, %36 : vector<16x1024xf32>
    %c0_21 = arith.constant 0 : index
    %c0_22 = arith.constant 0 : index
    %38 = vector.load %arg12[%c0_21, %c0_22] : memref<8x1024xf32, #tpu.memory_space<vmem>>, vector<8x1024xf32>
    %39 = vector.shape_cast %37 : vector<16x1024xf32> to vector<2x8x1024xf32>
    %cst_23 = arith.constant dense<0.000000e+00> : vector<8x1024xf32>
    %40 = vector.multi_reduction <add>, %39, %cst_23 [0] : vector<2x8x1024xf32> to vector<8x1024xf32>
    %41 = arith.addf %38, %40 : vector<8x1024xf32>
    %c0_24 = arith.constant 0 : index
    %c0_25 = arith.constant 0 : index
    %42 = vector.load %arg12[%c0_24, %c0_25] : memref<8x1024xf32, #tpu.memory_space<vmem>>, vector<8x1024xf32>
    tpu.vector_store %arg12[%c0_24, %c0_25], %41 {strides = array<i32>} : memref<8x1024xf32, #tpu.memory_space<vmem>>, vector<8x1024xf32>,
    %c0_i32_26 = arith.constant 0 : i32
    %43 = arith.cmpi eq, %arg1, %c0_i32_26 : i32
    %44 = arith.extui %43 : i1 to i32
    %c0_i32_27 = arith.constant 0 : i32
    %45 = arith.cmpi ne, %44, %c0_i32_27 : i32
    scf.if %45 {
      %c0_28 = arith.constant 0 : index
      %c0_29 = arith.constant 0 : index
      %46 = vector.load %arg12[%c0_28, %c0_29] : memref<8x1024xf32, #tpu.memory_space<vmem>>, vector<8x1024xf32>
      %47 = vector.shape_cast %46 : vector<8x1024xf32> to vector<1x8x1024xf32>
      %cst_30 = arith.constant dense<0.000000e+00> : vector<1xf32>
      %48 = vector.multi_reduction <add>, %47, %cst_30 [1, 2] : vector<1x8x1024xf32> to vector<1xf32>
      %49 = vector.shape_cast %48 : vector<1xf32> to vector<1x1x1xf32>
      %50 = vector.extract %49[0, 0, 0] : f32 from vector<1x1x1xf32>
      %51 = vector.broadcast %50 : f32 to vector<1x1xf32>
      %c0_31 = arith.constant 0 : index
      %c0_32 = arith.constant 0 : index
      %52 = vector.load %arg11[%c0_31, %c0_32] : memref<1x1xf32, #tpu.memory_space<vmem>>, vector<1x1xf32>
      tpu.vector_store %arg11[%c0_31, %c0_32], %51 {strides = array<i32>} : memref<1x1xf32, #tpu.memory_space<vmem>>, vector<1x1xf32>,
    } else {
    }
    return
  }
  func.func @transform_0(%arg0: i32, %arg1: i32) -> (i32, i32) {
    %c1_i32 = arith.constant 1 : i32
    %0 = arith.muli %arg0, %c1_i32 : i32
    %1 = arith.addi %0, %arg1 : i32
    %c0_i32 = arith.constant 0 : i32
    %c0_i32_0 = arith.constant 0 : i32
    return %1, %c0_i32 : i32, i32
  }
  func.func @transform_1(%arg0: i32, %arg1: i32) -> (i32, i32) {
    %c1_i32 = arith.constant 1 : i32
    %0 = arith.muli %arg0, %c1_i32 : i32
    %1 = arith.addi %0, %arg1 : i32
    %c0_i32 = arith.constant 0 : i32
    %c0_i32_0 = arith.constant 0 : i32
    return %1, %c0_i32 : i32, i32
  }
  func.func @transform_2(%arg0: i32, %arg1: i32) -> (i32, i32) {
    %c1_i32 = arith.constant 1 : i32
    %0 = arith.muli %arg0, %c1_i32 : i32
    %1 = arith.addi %0, %arg1 : i32
    %c0_i32 = arith.constant 0 : i32
    %c0_i32_0 = arith.constant 0 : i32
    return %1, %c0_i32 : i32, i32
  }
  func.func @transform_3(%arg0: i32, %arg1: i32) -> (i32, i32) {
    %c1_i32 = arith.constant 1 : i32
    %0 = arith.muli %arg0, %c1_i32 : i32
    %1 = arith.addi %0, %arg1 : i32
    %c0_i32 = arith.constant 0 : i32
    %c0_i32_0 = arith.constant 0 : i32
    return %1, %c0_i32 : i32, i32
  }
  func.func @transform_4(%arg0: i32, %arg1: i32) -> (i32, i32) {
    %c0_i32 = arith.constant 0 : i32
    %c0_i32_0 = arith.constant 0 : i32
    %c0_i32_1 = arith.constant 0 : i32
    return %c0_i32, %c0_i32_0 : i32, i32
  }
  func.func @transform_5(%arg0: i32, %arg1: i32) -> (i32, i32) {
    %c0_i32 = arith.constant 0 : i32
    %c0_i32_0 = arith.constant 0 : i32
    %c0_i32_1 = arith.constant 0 : i32
    return %c0_i32, %c0_i32_0 : i32, i32
  }
  func.func @transform_6(%arg0: i32, %arg1: i32) -> (i32, i32) {
    %c0_i32 = arith.constant 0 : i32
    %c0_i32_0 = arith.constant 0 : i32
    %c0_i32_1 = arith.constant 0 : i32
    return %c0_i32, %c0_i32_0 : i32, i32
  }
  func.func @transform_7(%arg0: i32, %arg1: i32) -> (i32, i32) {
    %c0_i32 = arith.constant 0 : i32
    %c0_i32_0 = arith.constant 0 : i32
    %c0_i32_1 = arith.constant 0 : i32
    return %c0_i32, %c0_i32_0 : i32, i32
  }
  func.func @transform_8(%arg0: i32, %arg1: i32) -> (i32, i32) {
    %c0_i32 = arith.constant 0 : i32
    %c0_i32_0 = arith.constant 0 : i32
    %c0_i32_1 = arith.constant 0 : i32
    return %c0_i32, %c0_i32_0 : i32, i32
  }
  func.func @transform_9(%arg0: i32, %arg1: i32) -> (i32, i32) {
    %c0_i32 = arith.constant 0 : i32
    %c0_i32_0 = arith.constant 0 : i32
    return %arg0, %c0_i32 : i32, i32
  }
}

</mosaic_0001>

<bundles_post_ra>
// kernel: tpu_custom_call.1
= control target key start
LH: loop header
LB: loop body
LE: loop exit
PB: predicated region body
PF: predicated region fallthrough
CT: control target
= control target key end

     0   :  { %14 = vsyncpa [#allocation4], 0  ;;  %s3490_s0 = inlined_call_operand.hbm [shape: bf16[16,1024], index: 0, kind: input, shape index: {}]   ;;  %s3491_s1 = inlined_call_operand.hbm [shape: f32[16,1024], index: 1, kind: input, shape index: {}]   ;;  %s3492_s2 = inlined_call_operand.vmem [shape: f32[16,3], index: 2, kind: input, shape index: {}]   ;;  %s3493_s3 = inlined_call_operand.vmem [shape: f32[16,128], index: 3, kind: input, shape index: {}]   ;;  %s3494_s4 = inlined_call_operand.hbm [shape: bf16[1024,256], index: 4, kind: input, shape index: {}]   ;;  %s3495_s5 = inlined_call_operand.hbm [shape: bf16[128,256], index: 5, kind: input, shape index: {}]   ;;  %s3496_s6 = inlined_call_operand.vmem [shape: f32[1,256], index: 6, kind: input, shape index: {}]   ;;  %s3497_s7 = inlined_call_operand.hbm [shape: bf16[256,1024], index: 7, kind: input, shape index: {}]   ;;  %s3498_s8 = inlined_call_operand.vmem [shape: f32[1,1024], index: 8, kind: input, shape index: {}]   ;;  %s3499_s9 = inlined_call_operand.hbm [shape: f32[1,1], index: 9, kind: output, shape index: {}]  }
   0x1   :  { %15 = vsyncpa [#allocation7], 0 }
   0x2   :  { %16 = vsyncpa [#allocation10], 0 }
   0x3   :  { %17 = vsyncpa [#allocation5], 0  ;;  %s3202_s30 = smov [#allocation6]   ;;  %s3062_s13 = scalar_lea.hbm %s3491_s1, 2048 }
   0x4   :  { %s45_s10 = sshll.u32 %s3202_s30, 4  ;;  %p3063_p0 = scmp.ne.s32.totalorder %s3491_s1, %s3062_s13  ;;  %s46_s10 = int_to_ptr.vmem [resolvable:$true] %s45_s10 }
   0x5   :  { %p3066_p1 = scmp.lt.u32.totalorder %s3062_s13, %s3491_s1 }
   0x7   :  { %p3068_p2 = pnand %p3066_p1, %p3063_p0 }
   0x9   :  { %3071 = shalt.err (!%p3068_p2)
}
   0xa   :  { %s3072_s18 = scalar_lea.vmem %s46_s10, 2048  ;;  %p3077_p4 = scmp.lt.s32.totalorder %s46_s10, %s46_s10 }
   0xb   :  { %p3073_p3 = scmp.ne.s32.totalorder %s46_s10, %s3072_s18  ;;  %p3078_p5 = scmp.lt.s32.totalorder %s3072_s18, %s3072_s18 }
   0xd   :  { %p3079_p6 = por %p3078_p5, %p3077_p4 }
   0xf   :  { %p3080_p7 = pnand %p3079_p6, %p3073_p3 }
  0x11   :  { %3083 = shalt.err (!%p3080_p7)
}
  0x12   :  { %s3203_s19 = smov 1024   ;;  %s3204_s20 = smov 64  }
  0x13   :  { %51 = dma.hbm_to_vmem [thread:$0]  %s3491_s1, 2048, %s46_s10, [#allocation7], %s3203_s19, %s3203_s19, %s3204_s20  }
  0x14   :  { %s3205_s23 = smov [#allocation9]   ;;  %s3206_s25 = smov [#allocation3]  }
  0x15   :  { %s89_s24 = sshll.u32 %s3205_s23, 4  ;;  %s28_s26 = sshll.u32 %s3206_s25, 4  ;;  %s90_s24 = int_to_ptr.vmem [resolvable:$true] %s89_s24  ;;  %s29_s26 = int_to_ptr.vmem [resolvable:$true] %s28_s26 }
  0x16   :  { %s3084_s29 = scalar_lea.hbm %s3495_s5, 2048 }
  0x17   :  { %p3085_p8 = scmp.ne.s32.totalorder %s3495_s5, %s3084_s29  ;;  %p3088_p9 = scmp.lt.u32.totalorder %s3084_s29, %s3495_s5 }
  0x19   :  { %p3090_p10 = pnand %p3088_p9, %p3085_p8 }
  0x1b   :  { %3093 = shalt.err (!%p3090_p10)
}
  0x1c   :  { %s3094_s1 = scalar_lea.vmem %s90_s24, 2048  ;;  %p3099_p12 = scmp.lt.s32.totalorder %s90_s24, %s90_s24 }
  0x1d   :  { %p3095_p11 = scmp.ne.s32.totalorder %s90_s24, %s3094_s1  ;;  %p3100_p13 = scmp.lt.s32.totalorder %s3094_s1, %s3094_s1 }
  0x1f   :  { %p3101_p0 = por %p3100_p13, %p3099_p12 }
  0x21   :  { %p3102_p1 = pnand %p3101_p0, %p3095_p11 }
  0x23   :  { %3105 = shalt.err (!%p3102_p1)
}
  0x24   :  { %s3207_s10 = smov 128   ;;  %s3208_s14 = smov 8  }
  0x25   :  { %95 = dma.hbm_to_vmem [thread:$0]  %s3495_s5, 2048, %s90_s24, [#allocation10], %s3207_s10, %s3207_s10, %s3208_s14  }
  0x26   :  { %s3106_s19 = scalar_lea.hbm %s3490_s0, 1024 }
  0x27   :  { %p3107_p2 = scmp.ne.s32.totalorder %s3490_s0, %s3106_s19  ;;  %p3110_p3 = scmp.lt.u32.totalorder %s3106_s19, %s3490_s0 }
  0x29   :  { %p3112_p4 = pnand %p3110_p3, %p3107_p2 }
  0x2b   :  { %3115 = shalt.err (!%p3112_p4)
}
  0x2c   :  { %s3116_s25 = scalar_lea.vmem %s29_s26, 1024  ;;  %p3121_p6 = scmp.lt.s32.totalorder %s29_s26, %s29_s26 }
  0x2d   :  { %p3117_p5 = scmp.ne.s32.totalorder %s29_s26, %s3116_s25  ;;  %p3122_p7 = scmp.lt.s32.totalorder %s3116_s25, %s3116_s25 }
  0x2f   :  { %p3123_p8 = por %p3122_p7, %p3121_p6 }
  0x31   :  { %p3124_p9 = pnand %p3123_p8, %p3117_p5 }
  0x33   :  { %3127 = shalt.err (!%p3124_p9)
}
  0x34   :  { %s3209_s5 = smov 512   ;;  %s3210_s24 = smov 32  }
  0x35   :  { %34 = dma.hbm_to_vmem [thread:$0]  %s3490_s0, 1024, %s29_s26, [#allocation4], %s3209_s5, %s3209_s5, %s3210_s24  }
  0x36   :  { %s3211_s29 = smov [#allocation8]   ;;  %s3212_s11 = smov [#allocation11]  }
  0x37   :  { %s77_s30 = sshll.u32 %s3211_s29, 4  ;;  %s103_s12 = sshll.u32 %s3212_s11, 4  ;;  %s78_s30 = int_to_ptr.vmem [resolvable:$true] %s77_s30  ;;  %s104_s12 = int_to_ptr.vmem [resolvable:$true] %s103_s12 }
  0x38   :  { %s3128_s15 = scalar_lea.hbm %s3494_s4, 16384 }
  0x39   :  { %p3129_p10 = scmp.ne.s32.totalorder %s3494_s4, %s3128_s15  ;;  %p3132_p11 = scmp.lt.u32.totalorder %s3128_s15, %s3494_s4 }
  0x3b   :  { %p3134_p12 = pnand %p3132_p11, %p3129_p10 }
  0x3d   :  { %3137 = shalt.err (!%p3134_p12)
}
  0x3e   :  { %s3138_s0 = scalar_lea.vmem %s78_s30, 16384  ;;  %p3143_p0 = scmp.lt.s32.totalorder %s78_s30, %s78_s30 }
  0x3f   :  { %p3139_p13 = scmp.ne.s32.totalorder %s78_s30, %s3138_s0  ;;  %p3144_p1 = scmp.lt.s32.totalorder %s3138_s0, %s3138_s0 }
  0x41   :  { %p3145_p2 = por %p3144_p1, %p3143_p0 }
  0x43   :  { %p3146_p3 = pnand %p3145_p2, %p3139_p13 }
  0x45   :  { %3149 = shalt.err (!%p3146_p3)
}
  0x46   :  { %83 = dma.hbm_to_vmem [thread:$0]  %s3494_s4, 16384, %s78_s30, [#allocation7], %s3207_s10, %s3207_s10, %s3208_s14  }
  0x47   :  { %s3150_s23 = scalar_lea.hbm %s3497_s7, 16384 }
  0x48   :  { %p3151_p4 = scmp.ne.s32.totalorder %s3497_s7, %s3150_s23  ;;  %p3154_p5 = scmp.lt.u32.totalorder %s3150_s23, %s3497_s7 }
  0x4a   :  { %p3156_p6 = pnand %p3154_p5, %p3151_p4 }
  0x4c   :  { %3159 = shalt.err (!%p3156_p6)
}
  0x4d   :  { %s3160_s11 = scalar_lea.vmem %s104_s12, 16384  ;;  %p3165_p8 = scmp.lt.s32.totalorder %s104_s12, %s104_s12 }
  0x4e   :  { %p3161_p7 = scmp.ne.s32.totalorder %s104_s12, %s3160_s11  ;;  %p3166_p9 = scmp.lt.s32.totalorder %s3160_s11, %s3160_s11 }
  0x50   :  { %p3167_p10 = por %p3166_p9, %p3165_p8 }
  0x52   :  { %p3168_p11 = pnand %p3167_p10, %p3161_p7 }
  0x54   :  { %3171 = shalt.err (!%p3168_p11)
}
  0x55   :  { %109 = dma.hbm_to_vmem [thread:$0]  %s3497_s7, 16384, %s104_s12, [#allocation10], %s3209_s5, %s3209_s5, %s3210_s24  }
  0x56   :  { %3194 = dma.done.wait [#allocation4], 1024  }
  0x57   :  { %3195 = vsyncadd [#allocation4], 4294966272 }
  0x58   :  { %3196 = dma.done.wait [#allocation7], 18432  }
  0x59   :  { %3197 = vsyncadd [#allocation7], 4294948864 }
  0x5a   :  { %3198 = dma.done.wait [#allocation10], 18432  }
  0x5b   :  { %3199 = vsyncadd [#allocation10], 4294948864  ;;  %v3213_v0 = vmov 1   ;;  %v3214_v1 = vmov 0   ;;  %v212_v2 = vld [vmem:[%s3492_s2] sm:$0xff]  ;;  %v213_v3 = vld [vmem:[%s3492_s2 + $0x8] sm:$0xff] }
  0x5c   :  { %2827 = vset.pattern.permute.xlu1 %v3213_v0  ;;  %2826 = vset.pattern.permute.xlu0 %v3214_v1  ;;  %v2830_v4 = vld [vmem:[#allocation9 + $0x4] ss:$8 sps:$4 sm:$0xff]   ;;  %v2832_v5 = vld [vmem:[#allocation9] ss:$8 sps:$4 sm:$0xff]   ;;  %v2833_v6 = vld [vmem:[#allocation9 + $0x14] ss:$8 sps:$4 sm:$0xff]  }
  0x5d   :  { %547 = vmatprep.mubr.bf16.mxu0 %v3214_v1  ;;  %241 = vperm.xlu1 %2827, %v212_v2   ;;  %v2835_v7 = vld [vmem:[#allocation9 + $0x10] ss:$8 sps:$4 sm:$0xff]   ;;  %v2836_v8 = vld [vmem:[#allocation9 + $0x24] ss:$8 sps:$4 sm:$0xff]   ;;  %v2838_v9 = vld [vmem:[#allocation9 + $0x20] ss:$8 sps:$4 sm:$0xff]  }
  0x5e   :  { %216 = vperm.xlu0 %2826, %v212_v2   ;;  %515 = vmatprep.subr.bf16.mxu0 %v2830_v4  ;;  %v2839_v10 = vld [vmem:[#allocation9 + $0x34] ss:$8 sps:$4 sm:$0xff]   ;;  %v2841_v11 = vld [vmem:[#allocation9 + $0x30] ss:$8 sps:$4 sm:$0xff]   ;;  %v2842_v12 = vld [vmem:[#allocation9 + $0x44] ss:$8 sps:$4 sm:$0xff]  }
  0x5f   :  { %516 = vmatpush1.bf16.msra.mxu0 %v2832_v5  ;;  %v2844_v13 = vld [vmem:[#allocation9 + $0x40] ss:$8 sps:$4 sm:$0xff]   ;;  %v2845_v14 = vld [vmem:[#allocation9 + $0x54] ss:$8 sps:$4 sm:$0xff]   ;;  %v2847_v15 = vld [vmem:[#allocation9 + $0x50] ss:$8 sps:$4 sm:$0xff]  }
  0x60   :  { %517 = vmatprep.subr.bf16.mxu0 %v2833_v6  ;;  %v2848_v16 = vld [vmem:[#allocation9 + $0x64] ss:$8 sps:$4 sm:$0xff]   ;;  %v2850_v17 = vld [vmem:[#allocation9 + $0x60] ss:$8 sps:$4 sm:$0xff]   ;;  %v2851_v18 = vld [vmem:[#allocation9 + $0x74] ss:$8 sps:$4 sm:$0xff]  }
  0x61   :  { %245 = vperm.xlu1 %2827, %v213_v3   ;;  %v2853_v19 = vld [vmem:[#allocation9 + $0x70] ss:$8 sps:$4 sm:$0xff]   ;;  %v416_v20 = vld [vmem:[%s3493_s3] sm:$0xff]  ;;  %v417_v21 = vld [vmem:[%s3493_s3 + $0x8] sm:$0xff]  ;;  %vm2490_vm0 = vcmask 0  }
  0x62   :  { %221 = vperm.xlu0 %2826, %v213_v3   ;;  %v2856_v22 = vld [vmem:[#allocation8 + $0x4] ss:$8 sps:$4 sm:$0xff]   ;;  %v418_v23 = vpack.c.bf16 %v417_v21, %v416_v20  ;;  %v2854_v24 = vld [vmem:[#allocation8] ss:$8 sps:$4 sm:$0xff]   ;;  %v2859_v25 = vld [vmem:[#allocation8 + $0x14] ss:$8 sps:$4 sm:$0xff]  }
  0x63   :  { %518 = vmatpush1.bf16.msra.mxu0 %v2835_v7  ;;  %v2857_v26 = vld [vmem:[#allocation8 + $0x10] ss:$8 sps:$4 sm:$0xff]   ;;  %v2862_v27 = vld [vmem:[#allocation8 + $0x24] ss:$8 sps:$4 sm:$0xff]   ;;  %v2860_v28 = vld [vmem:[#allocation8 + $0x20] ss:$8 sps:$4 sm:$0xff]  }
  0x64   :  { %519 = vmatprep.subr.bf16.mxu0 %v2836_v8  ;;  %v2865_v29 = vld [vmem:[#allocation8 + $0x34] ss:$8 sps:$4 sm:$0xff]   ;;  %v2863_v30 = vld [vmem:[#allocation8 + $0x30] ss:$8 sps:$4 sm:$0xff]   ;;  %v2868_v31 = vld [vmem:[#allocation8 + $0x44] ss:$8 sps:$4 sm:$0xff]  }
  0x65   :  { %v2866_v32 = vld [vmem:[#allocation8 + $0x40] ss:$8 sps:$4 sm:$0xff]   ;;  %v2871_v33 = vld [vmem:[#allocation8 + $0x54] ss:$8 sps:$4 sm:$0xff]   ;;  %v2869_v34 = vld [vmem:[#allocation8 + $0x50] ss:$8 sps:$4 sm:$0xff]  }
  0x66   :  { %v2874_v35 = vld [vmem:[#allocation8 + $0x64] ss:$8 sps:$4 sm:$0xff]   ;;  %v2872_v36 = vld [vmem:[#allocation8 + $0x60] ss:$8 sps:$4 sm:$0xff]   ;;  %v2877_v37 = vld [vmem:[#allocation8 + $0x74] ss:$8 sps:$4 sm:$0xff]  }
  0x67   :  { %520 = vmatpush1.bf16.msra.mxu0 %v2838_v9  ;;  %v2875_v38 = vld [vmem:[#allocation8 + $0x70] ss:$8 sps:$4 sm:$0xff]   ;;  %v2880_v39 = vld [vmem:[#allocation8 + $0x84] ss:$8 sps:$4 sm:$0xff]   ;;  %v2878_v40 = vld [vmem:[#allocation8 + $0x80] ss:$8 sps:$4 sm:$0xff]  }
  0x68   :  { %521 = vmatprep.subr.bf16.mxu0 %v2839_v10  ;;  %v2883_v41 = vld [vmem:[#allocation8 + $0x94] ss:$8 sps:$4 sm:$0xff]   ;;  %v2881_v42 = vld [vmem:[#allocation8 + $0x90] ss:$8 sps:$4 sm:$0xff]   ;;  %v2886_v43 = vld [vmem:[#allocation8 + $0xa4] ss:$8 sps:$4 sm:$0xff]  }
  0x69   :  { %v2884_v44 = vld [vmem:[#allocation8 + $0xa0] ss:$8 sps:$4 sm:$0xff]   ;;  %v2889_v45 = vld [vmem:[#allocation8 + $0xb4] ss:$8 sps:$4 sm:$0xff]   ;;  %v2887_v46 = vld [vmem:[#allocation8 + $0xb0] ss:$8 sps:$4 sm:$0xff]  }
  0x6a   :  { %v2892_v47 = vld [vmem:[#allocation8 + $0xc4] ss:$8 sps:$4 sm:$0xff]   ;;  %v2890_v48 = vld [vmem:[#allocation8 + $0xc0] ss:$8 sps:$4 sm:$0xff]   ;;  %v2895_v49 = vld [vmem:[#allocation8 + $0xd4] ss:$8 sps:$4 sm:$0xff]  }
  0x6b   :  { %522 = vmatpush1.bf16.msra.mxu0 %v2841_v11  ;;  %v2893_v50 = vld [vmem:[#allocation8 + $0xd0] ss:$8 sps:$4 sm:$0xff]   ;;  %v2898_v51 = vld [vmem:[#allocation8 + $0xe4] ss:$8 sps:$4 sm:$0xff]   ;;  %v2896_v52 = vld [vmem:[#allocation8 + $0xe0] ss:$8 sps:$4 sm:$0xff]  }
  0x6c   :  { %523 = vmatprep.subr.bf16.mxu0 %v2842_v12  ;;  %v2901_v53 = vld [vmem:[#allocation8 + $0xf4] ss:$8 sps:$4 sm:$0xff]   ;;  %v2899_v54 = vld [vmem:[#allocation8 + $0xf0] ss:$8 sps:$4 sm:$0xff]   ;;  %v2904_v55 = vld [vmem:[#allocation8 + $0x104] ss:$8 sps:$4 sm:$0xff]  }
  0x6d   :  { %v172_v56 = vld [vmem:[#allocation3] sm:$0xff]  ;;  %v173_v57 = vld [vmem:[#allocation3 + $0x8] sm:$0xff]  ;;  %v174_v58 = vld [vmem:[#allocation3 + $0x10] sm:$0xff] }
  0x6e   :  { %v176_v59 = vld [vmem:[#allocation3 + $0x20] sm:$0xff]  ;;  %v181_v60 = vunpack.c.h.bf16 %v172_v56  ;;  %v3351_v61 = vld [vmem:[#allocation3 + $0x28] sm:$0xff]  ;;  %v182_v62 = vunpack.c.l.bf16 %v173_v57  ;;  %v180_v63 = vunpack.c.l.bf16 %v172_v56  ;;  %v183_v0 = vunpack.c.h.bf16 %v173_v57  ;;  %v198_v1 = vld [vmem:[#allocation6 + $0x10] sm:$0xff] }
  0x6f   :  { %524 = vmatpush1.bf16.msra.mxu0 %v2844_v13  ;;  %v175_v2 = vld [vmem:[#allocation3 + $0x18] sm:$0xff]  ;;  %v197_v5 = vld [vmem:[#allocation6 + $0x8] sm:$0xff]  ;;  %v196_v6 = vld [vmem:[#allocation6] sm:$0xff]  ;;  %v185_v7 = vunpack.c.h.bf16 %v174_v58  ;;  %v188_v8 = vunpack.c.l.bf16 %v176_v59  ;;  %v189_v9 = vunpack.c.h.bf16 %v176_v59  ;;  %v191_v10 = vunpack.c.h.bf16 %v3351_v61 }
  0x70   :  { %525 = vmatprep.subr.bf16.mxu0 %v2845_v14  ;;  %v199_v11 = vld [vmem:[#allocation6 + $0x18] sm:$0xff]  ;;  %v184_v12 = vunpack.c.l.bf16 %v174_v58  ;;  %v201_v13 = vld [vmem:[#allocation6 + $0x28] sm:$0xff] }
  0x71   :  { %v205_v14 = vld [vmem:[#allocation6 + $0x48] sm:$0xff] }
  0x73   :  { %526 = vmatpush1.bf16.msra.mxu0 %v2847_v15 }
  0x74   :  { %527 = vmatprep.subr.bf16.mxu0 %v2848_v16  ;;  %v204_v16 = vld [vmem:[#allocation6 + $0x40] sm:$0xff] }
  0x77   :  { %528 = vmatpush1.bf16.msra.mxu0 %v2850_v17 }
  0x78   :  { %529 = vmatprep.subr.bf16.mxu0 %v2851_v18 }
  0x7b   :  { %530 = vmatpush1.bf16.msra.mxu0 %v2853_v19  ;;  %v187_v19 = vunpack.c.h.bf16 %v175_v2 }
  0x7c   :  { %1198 = vmatprep.subr.bf16.mxu0 %v2856_v22 }
  0x7e   :  { %548 = vmatmul.mubr.bf16.vlgmr.msra.gmra.mrb[0].mxu0 %v418_v23  ;;  %v207_v23 = vld [vmem:[#allocation6 + $0x58] sm:$0xff] }
  0x7f   :  { %1199 = vmatpush1.bf16.msra.mxu0 %v2854_v24 }
  0x80   :  { %1200 = vmatprep.subr.bf16.mxu0 %v2859_v25  ;;  %v200_v25 = vld [vmem:[#allocation6 + $0x20] sm:$0xff] }
  0x83   :  { %1201 = vmatpush1.bf16.msra.mxu0 %v2857_v26 }
  0x84   :  { %1202 = vmatprep.subr.bf16.mxu0 %v2862_v27 }
  0x87   :  { %1203 = vmatpush1.bf16.msra.mxu0 %v2860_v28 }
  0x88   :  { %1204 = vmatprep.subr.bf16.mxu0 %v2865_v29 }
  0x8b   :  { %1205 = vmatpush1.bf16.msra.mxu0 %v2863_v30 }
  0x8c   :  { %1206 = vmatprep.subr.bf16.mxu0 %v2868_v31 }
  0x8f   :  { %1207 = vmatpush1.bf16.msra.mxu0 %v2866_v32 }
  0x90   :  { %1208 = vmatprep.subr.bf16.mxu0 %v2871_v33 }
  0x93   :  { %1209 = vmatpush1.bf16.msra.mxu0 %v2869_v34 }
  0x94   :  { %1210 = vmatprep.subr.bf16.mxu0 %v2874_v35 }
  0x97   :  { %1211 = vmatpush1.bf16.msra.mxu0 %v2872_v36 }
  0x98   :  { %1212 = vmatprep.subr.bf16.mxu0 %v2877_v37 }
  0x9b   :  { %1213 = vmatpush1.bf16.msra.mxu0 %v2875_v38 }
  0x9c   :  { %1214 = vmatprep.subr.bf16.mxu0 %v2880_v39 }
  0x9f   :  { %1215 = vmatpush1.bf16.msra.mxu0 %v2878_v40 }
  0xa0   :  { %1216 = vmatprep.subr.bf16.mxu0 %v2883_v41 }
  0xa3   :  { %1217 = vmatpush1.bf16.msra.mxu0 %v2881_v42 }
  0xa4   :  { %1218 = vmatprep.subr.bf16.mxu0 %v2886_v43 }
  0xa7   :  { %1219 = vmatpush1.bf16.msra.mxu0 %v2884_v44 }
  0xa8   :  { %1220 = vmatprep.subr.bf16.mxu0 %v2889_v45 }
  0xab   :  { %1221 = vmatpush1.bf16.msra.mxu0 %v2887_v46  ;;  %v186_v46 = vunpack.c.l.bf16 %v175_v2  ;;  %v2913_v2 = vld [vmem:[#allocation8 + $0x134] ss:$8 sps:$4 sm:$0xff]  }
  0xac   :  { %1222 = vmatprep.subr.bf16.mxu0 %v2892_v47  ;;  %v203_v47 = vld [vmem:[#allocation6 + $0x38] sm:$0xff] }
  0xaf   :  { %1223 = vmatpush1.bf16.msra.mxu0 %v2890_v48 }
  0xb0   :  { %1224 = vmatprep.subr.bf16.mxu0 %v2895_v49  ;;  %v2902_v49 = vld [vmem:[#allocation8 + $0x100] ss:$8 sps:$4 sm:$0xff]  }
  0xb3   :  { %1225 = vmatpush1.bf16.msra.mxu0 %v2893_v50 }
  0xb4   :  { %1226 = vmatprep.subr.bf16.mxu0 %v2898_v51 }
  0xb7   :  { %1227 = vmatpush1.bf16.msra.mxu0 %v2896_v52  ;;  %v202_v52 = vld [vmem:[#allocation6 + $0x30] sm:$0xff] }
  0xb8   :  { %1228 = vmatprep.subr.bf16.mxu0 %v2901_v53  ;;  %v2907_v53 = vld [vmem:[#allocation8 + $0x114] ss:$8 sps:$4 sm:$0xff]  }
  0xbb   :  { %1229 = vmatpush1.bf16.msra.mxu0 %v2899_v54 }
  0xbc   :  { %1241 = vmatprep.subr.bf16.mxu0 %v2904_v55 }
  0xdc   :  { %v242_v3 = vpop.permute.xlu1 %241 }
  0xdd   :  { %v217_v4 = vpop.permute.xlu0 %216  ;;  %v250_v18 = vmul.f32 %v242_v3, %v198_v1  ;;  %v249_v20 = vmul.f32 %v242_v3, %v197_v5  ;;  %v248_v22 = vmul.f32 %v242_v3, %v196_v6  ;;  %v251_v28 = vmul.f32 %v242_v3, %v199_v11  ;;  %v2908_v1 = vld [vmem:[#allocation8 + $0x120] ss:$8 sps:$4 sm:$0xff]   ;;  %v2911_v5 = vld [vmem:[#allocation8 + $0x130] ss:$8 sps:$4 sm:$0xff]   ;;  %v2916_v6 = vld [vmem:[#allocation8 + $0x144] ss:$8 sps:$4 sm:$0xff]  }
  0xde   :  { %v225_v15 = vmul.f32 %v217_v4, %v181_v60  ;;  %v226_v17 = vmul.f32 %v217_v4, %v182_v62  ;;  %v224_v21 = vmul.f32 %v217_v4, %v180_v63  ;;  %v227_v24 = vmul.f32 %v217_v4, %v183_v0  ;;  %v2905_v60 = vld [vmem:[#allocation8 + $0x110] ss:$8 sps:$4 sm:$0xff]   ;;  %v2910_v63 = vld [vmem:[#allocation8 + $0x124] ss:$8 sps:$4 sm:$0xff]  }
  0xdf   :  { %v229_v30 = vmul.f32 %v217_v4, %v185_v7  ;;  %v253_v31 = vmul.f32 %v242_v3, %v201_v13  ;;  %v228_v38 = vmul.f32 %v217_v4, %v184_v12  ;;  %v252_v39 = vmul.f32 %v242_v3, %v200_v25  ;;  %v2917_v7 = vld [vmem:[#allocation8 + $0x150] ss:$8 sps:$4 sm:$0xff]   ;;  %v2928_v12 = vld [vmem:[#allocation8 + $0x184] ss:$8 sps:$4 sm:$0xff]   ;;  %v2926_v13 = vld [vmem:[#allocation8 + $0x180] ss:$8 sps:$4 sm:$0xff]  }
  0xe0   :  { %v3354_v26 = vpop.permute.xlu1 %245  ;;  %v3358_v29 = vadd.f32 %v250_v18, %v226_v17  ;;  %v265_v40 = vadd.f32 %v249_v20, %v225_v15  ;;  %v264_v42 = vadd.f32 %v248_v22, %v224_v21  ;;  %v267_v51 = vadd.f32 %v251_v28, %v227_v24  ;;  %v2923_v11 = vld [vmem:[#allocation8 + $0x170] ss:$8 sps:$4 sm:$0xff]   ;;  %v2932_v17 = vld [vmem:[#allocation8 + $0x1a0] ss:$8 sps:$4 sm:$0xff]   ;;  %v2937_v18 = vld [vmem:[#allocation8 + $0x1b4] ss:$8 sps:$4 sm:$0xff]  }
  0xe1   :  { %v3356_v27 = vpop.permute.xlu0 %221  ;;  %v257_v33 = vmul.f32 %v3354_v26, %v205_v14  ;;  %v256_v35 = vmul.f32 %v3354_v26, %v204_v16  ;;  %v259_v37 = vmul.f32 %v3354_v26, %v207_v23  ;;  %v3366_v45 = vadd.f32 %v253_v31, %v229_v30  ;;  %v2931_v14 = vld [vmem:[#allocation8 + $0x194] ss:$8 sps:$4 sm:$0xff]   ;;  %v2929_v15 = vld [vmem:[#allocation8 + $0x190] ss:$8 sps:$4 sm:$0xff]   ;;  %v2934_v16 = vld [vmem:[#allocation8 + $0x1a4] ss:$8 sps:$4 sm:$0xff]  }
  0xe2   :  { %v233_v32 = vmul.f32 %v3356_v27, %v189_v9  ;;  %v232_v34 = vmul.f32 %v3356_v27, %v188_v8  ;;  %v235_v36 = vmul.f32 %v3356_v27, %v191_v10  ;;  %v3368_v54 = vadd.f32 %v252_v39, %v228_v38  ;;  %v2922_v8 = vld [vmem:[#allocation8 + $0x164] ss:$8 sps:$4 sm:$0xff]   ;;  %v2920_v9 = vld [vmem:[#allocation8 + $0x160] ss:$8 sps:$4 sm:$0xff]   ;;  %v2925_v10 = vld [vmem:[#allocation8 + $0x174] ss:$8 sps:$4 sm:$0xff]  }
  0xe3   :  { %v231_v55 = vmul.f32 %v217_v4, %v187_v19  ;;  %v255_v57 = vmul.f32 %v242_v3, %v203_v47  ;;  %v230_v58 = vmul.f32 %v217_v4, %v186_v46  ;;  %v254_v59 = vmul.f32 %v242_v3, %v202_v52  ;;  %v2914_v4 = vld [vmem:[#allocation8 + $0x140] ss:$8 sps:$4 sm:$0xff]   ;;  %v2919_v3 = vld [vmem:[#allocation8 + $0x154] ss:$8 sps:$4 sm:$0xff]   ;;  %v2935_v19 = vld [vmem:[#allocation8 + $0x1b0] ss:$8 sps:$4 sm:$0xff]  }
  0xe4   :  { %v273_v41 = vadd.f32 %v257_v33, %v233_v32  ;;  %v272_v43 = vadd.f32 %v256_v35, %v232_v34  ;;  %v275_v44 = vadd.f32 %v259_v37, %v235_v36  ;;  %v2940_v20 = vld [vmem:[#allocation8 + $0x1c4] ss:$8 sps:$4 sm:$0xff]   ;;  %v2938_v21 = vld [vmem:[#allocation8 + $0x1c0] ss:$8 sps:$4 sm:$0xff]   ;;  %v2943_v22 = vld [vmem:[#allocation8 + $0x1d4] ss:$8 sps:$4 sm:$0xff]   ;;  %v190_v25 = vunpack.c.l.bf16 %v3351_v61 }
  0xe5   :  { %v3370_v62 = vadd.f32 %v255_v57, %v231_v55  ;;  %v3372_v0 = vadd.f32 %v254_v59, %v230_v58  ;;  %v3374_v23 = vld [vmem:[#allocation3 + $0x30] sm:$0xff]  ;;  %v2946_v28 = vld [vmem:[#allocation8 + $0x1e4] ss:$8 sps:$4 sm:$0xff]   ;;  %v2944_v33 = vld [vmem:[#allocation8 + $0x1e0] ss:$8 sps:$4 sm:$0xff]  }
  0xe6   :  { %v281_v48 = vpack.c.bf16 %v273_v41, %v265_v40  ;;  %v280_v50 = vpack.c.bf16 %v272_v43, %v264_v42  ;;  %v283_v56 = vpack.c.bf16 %v275_v44, %v267_v51  ;;  %v2941_v24 = vld [vmem:[#allocation8 + $0x1d0] ss:$8 sps:$4 sm:$0xff]   ;;  %v193_v31 = vunpack.c.h.bf16 %v3374_v23  ;;  %v209_v32 = vld [vmem:[#allocation6 + $0x68] sm:$0xff]  ;;  %v2949_v34 = vld [vmem:[#allocation8 + $0x1f4] ss:$8 sps:$4 sm:$0xff]  }
  0xe7   :  { %v206_v30 = vld [vmem:[#allocation6 + $0x50] sm:$0xff]  ;;  %v234_v35 = vmul.f32 %v3356_v27, %v190_v25  ;;  %v261_v38 = vmul.f32 %v3354_v26, %v209_v32  ;;  %v2952_v40 = vld [vmem:[#allocation8 + $0x204] ss:$8 sps:$4 sm:$0xff]   ;;  %v2950_v42 = vld [vmem:[#allocation8 + $0x200] ss:$8 sps:$4 sm:$0xff]  }
  0xe8   :  { %1230 = vmatprep.mubr.bf16.mxu0 %v281_v48  ;;  %v258_v36 = vmul.f32 %v3354_v26, %v206_v30  ;;  %v237_v37 = vmul.f32 %v3356_v27, %v193_v31  ;;  %v2947_v61 = vld [vmem:[#allocation8 + $0x1f0] ss:$8 sps:$4 sm:$0xff]   ;;  %v2955_v44 = vld [vmem:[#allocation8 + $0x214] ss:$8 sps:$4 sm:$0xff]   ;;  %v1392_v47 = vld [vmem:[#allocation11] sm:$0xff] }
  0xe9   :  { %1231 = vmatmul.mubr.bf16.vlgmr.msra.gmra.mrb[0].mxu0 %v280_v50  ;;  %v1396_v48 = vld [vmem:[#allocation11 + $0x20] sm:$0xff]  ;;  %v2953_v50 = vld [vmem:[#allocation8 + $0x210] ss:$8 sps:$4 sm:$0xff]  }
  0xea   :  { %1242 = vmatpush1.bf16.msra.mxu0 %v2902_v49  ;;  %1273 = vmatprep.mubr.bf16.mxu0 %v283_v56  ;;  %v274_v39 = vadd.f32 %v258_v36, %v234_v35  ;;  %v277_v41 = vadd.f32 %v261_v38, %v237_v37  ;;  %v1400_v49 = vld [vmem:[#allocation11 + $0x40] sm:$0xff]  ;;  %v2666_v51 = vcombine.high %v1392_v47, %v1396_v48  ;;  %v2971_v31 = vld [vmem:[#allocation8 + $0x270] ss:$8 sps:$4 sm:$0xff]  }
  0xeb   :  { %1243 = vmatprep.subr.bf16.mxu0 %v2907_v53  ;;  %v2665_v52 = vcombine.low %v1392_v47, %v1396_v48  ;;  %v1404_v53 = vld [vmem:[#allocation11 + $0x60] sm:$0xff] }
  0xec   :  { %v282_v43 = vpack.c.bf16 %v274_v39, %v3358_v29  ;;  %v285_v46 = vpack.c.bf16 %v277_v41, %v3366_v45  ;;  %v2958_v55 = vld [vmem:[#allocation8 + $0x224] ss:$8 sps:$4 sm:$0xff]   ;;  %v2674_v56 = vcombine.high %v1400_v49, %v1404_v53  ;;  %2202 = vmatprep.subr.bf16.mxu1 %v2666_v51  ;;  %v2673_v29 = vcombine.low %v1400_v49, %v1404_v53  ;;  %v2956_v45 = vld [vmem:[#allocation8 + $0x220] ss:$8 sps:$4 sm:$0xff]   ;;  %v2985_v51 = vld [vmem:[#allocation8 + $0x2b4] ss:$8 sps:$4 sm:$0xff]  }
  0xed   :  { %v1408_v57 = vld [vmem:[#allocation11 + $0x80] sm:$0xff]  ;;  %2203 = vmatpush1.bf16.msra.mxu1 %v2665_v52 }
  0xee   :  { %1244 = vmatpush1.bf16.msra.mxu0 %v2905_v60  ;;  %v1412_v58 = vld [vmem:[#allocation11 + $0xa0] sm:$0xff]  ;;  %2204 = vmatprep.subr.bf16.mxu1 %v2674_v56  ;;  %v2961_v60 = vld [vmem:[#allocation8 + $0x234] ss:$8 sps:$4 sm:$0xff]   ;;  %v2983_v56 = vld [vmem:[#allocation8 + $0x2b0] ss:$8 sps:$4 sm:$0xff]  }
  0xef   :  { %1245 = vmatprep.subr.bf16.mxu0 %v2910_v63  ;;  %v2682_v59 = vcombine.high %v1408_v57, %v1412_v58  ;;  %v1416_v63 = vld [vmem:[#allocation11 + $0xc0] sm:$0xff] }
  0xf0   :  { %v1448_v25 = vld [vmem:[#allocation11 + $0x1c0] sm:$0xff] }
  0xf1   :  { %2205 = vmatpush1.bf16.msra.mxu1 %v2673_v29  ;;  %v1460_v35 = vld [vmem:[#allocation11 + $0x220] sm:$0xff] }
  0xf2   :  { %1246 = vmatpush1.bf16.msra.mxu0 %v2908_v1  ;;  %v1420_v1 = vld [vmem:[#allocation11 + $0xe0] sm:$0xff]  ;;  %2206 = vmatprep.subr.bf16.mxu1 %v2682_v59 }
  0xf3   :  { %1247 = vmatprep.subr.bf16.mxu0 %v2913_v2  ;;  %v2681_v2 = vcombine.low %v1408_v57, %v1412_v58  ;;  %v2974_v37 = vld [vmem:[#allocation8 + $0x280] ss:$8 sps:$4 sm:$0xff]   ;;  %v2988_v58 = vld [vmem:[#allocation8 + $0x2c4] ss:$8 sps:$4 sm:$0xff]  }
  0xf4   :  { %v1464_v39 = vld [vmem:[#allocation11 + $0x240] sm:$0xff] }
  0xf5   :  { %2207 = vmatpush1.bf16.msra.mxu1 %v2681_v2  ;;  %v1476_v47 = vld [vmem:[#allocation11 + $0x2a0] sm:$0xff] }
  0xf6   :  { %1248 = vmatpush1.bf16.msra.mxu0 %v2911_v5  ;;  %v2959_v5 = vld [vmem:[#allocation8 + $0x230] ss:$8 sps:$4 sm:$0xff]   ;;  %v2980_v49 = vld [vmem:[#allocation8 + $0x2a0] ss:$8 sps:$4 sm:$0xff]  }
  0xf7   :  { %1249 = vmatprep.subr.bf16.mxu0 %v2916_v6  ;;  %v2690_v6 = vcombine.high %v1416_v63, %v1420_v1  ;;  %v1480_v52 = vld [vmem:[#allocation11 + $0x2c0] sm:$0xff] }
  0xf8   :  { %v1484_v53 = vld [vmem:[#allocation11 + $0x2e0] sm:$0xff] }
  0xf9   :  { %2208 = vmatprep.subr.bf16.mxu1 %v2690_v6  ;;  %v2754_v57 = vcombine.high %v1480_v52, %v1484_v53  ;;  %v1488_v29 = vld [vmem:[#allocation11 + $0x300] sm:$0xff]  ;;  %v2753_v59 = vcombine.low %v1480_v52, %v1484_v53  ;;  %v3384_v6 = vld [vmem:[#allocation3 + $0x38] sm:$0xff] }
  0xfa   :  { %1250 = vmatpush1.bf16.msra.mxu0 %v2914_v4  ;;  %v2964_v4 = vld [vmem:[#allocation8 + $0x244] ss:$8 sps:$4 sm:$0xff]   ;;  %v3039_v52 = vld [vmem:[#allocation8 + $0x3d4] ss:$8 sps:$4 sm:$0xff]   ;;  %v3037_v53 = vld [vmem:[#allocation8 + $0x3d0] ss:$8 sps:$4 sm:$0xff]  }
  0xfb   :  { %1251 = vmatprep.subr.bf16.mxu0 %v2919_v3  ;;  %v1424_v3 = vld [vmem:[#allocation11 + $0x100] sm:$0xff] }
  0xfc   :  { %v1496_v2 = vld [vmem:[#allocation11 + $0x340] sm:$0xff] }
  0xfe   :  { %1252 = vmatpush1.bf16.msra.mxu0 %v2917_v7  ;;  %v1428_v7 = vld [vmem:[#allocation11 + $0x120] sm:$0xff] }
  0xff   :  { %1253 = vmatprep.subr.bf16.mxu0 %v2922_v8  ;;  %v2689_v8 = vcombine.low %v1416_v63, %v1420_v1  ;;  %v2991_v1 = vld [vmem:[#allocation8 + $0x2d4] ss:$8 sps:$4 sm:$0xff]  }
 0x101   :  { %2209 = vmatpush1.bf16.msra.mxu1 %v2689_v8  ;;  %v192_v8 = vunpack.c.l.bf16 %v3374_v23 }
 0x102   :  { %1254 = vmatpush1.bf16.msra.mxu0 %v2920_v9  ;;  %v2962_v9 = vld [vmem:[#allocation8 + $0x240] ss:$8 sps:$4 sm:$0xff]  }
 0x103   :  { %1255 = vmatprep.subr.bf16.mxu0 %v2925_v10  ;;  %v2698_v10 = vcombine.high %v1424_v3, %v1428_v7 }
 0x105   :  { %2210 = vmatprep.subr.bf16.mxu1 %v2698_v10  ;;  %v3387_v10 = vld [vmem:[#allocation6 + $0x60] sm:$0xff] }
 0x106   :  { %1256 = vmatpush1.bf16.msra.mxu0 %v2923_v11  ;;  %v2967_v11 = vld [vmem:[#allocation8 + $0x254] ss:$8 sps:$4 sm:$0xff]  }
 0x107   :  { %1257 = vmatprep.subr.bf16.mxu0 %v2928_v12  ;;  %v1432_v12 = vld [vmem:[#allocation11 + $0x140] sm:$0xff] }
 0x10a   :  { %1258 = vmatpush1.bf16.msra.mxu0 %v2926_v13  ;;  %v1436_v13 = vld [vmem:[#allocation11 + $0x160] sm:$0xff] }
 0x10b   :  { %1259 = vmatprep.subr.bf16.mxu0 %v2931_v14  ;;  %v2697_v14 = vcombine.low %v1424_v3, %v1428_v7  ;;  %v2989_v3 = vld [vmem:[#allocation8 + $0x2d0] ss:$8 sps:$4 sm:$0xff]  }
 0x10d   :  { %2211 = vmatpush1.bf16.msra.mxu1 %v2697_v14  ;;  %v2992_v14 = vld [vmem:[#allocation8 + $0x2e0] ss:$8 sps:$4 sm:$0xff]  }
 0x10e   :  { %1260 = vmatpush1.bf16.msra.mxu0 %v2929_v15  ;;  %v2965_v15 = vld [vmem:[#allocation8 + $0x250] ss:$8 sps:$4 sm:$0xff]  }
 0x10f   :  { %1261 = vmatprep.subr.bf16.mxu0 %v2934_v16  ;;  %v2706_v16 = vcombine.high %v1432_v12, %v1436_v13 }
 0x111   :  { %2212 = vmatprep.subr.bf16.mxu1 %v2706_v16  ;;  %v236_v16 = vmul.f32 %v3356_v27, %v192_v8 }
 0x112   :  { %1262 = vmatpush1.bf16.msra.mxu0 %v2932_v17  ;;  %v2970_v17 = vld [vmem:[#allocation8 + $0x264] ss:$8 sps:$4 sm:$0xff]  }
 0x113   :  { %1263 = vmatprep.subr.bf16.mxu0 %v2937_v18  ;;  %v1440_v18 = vld [vmem:[#allocation11 + $0x180] sm:$0xff] }
 0x116   :  { %1264 = vmatpush1.bf16.msra.mxu0 %v2935_v19  ;;  %v1444_v19 = vld [vmem:[#allocation11 + $0x1a0] sm:$0xff] }
 0x117   :  { %1265 = vmatprep.subr.bf16.mxu0 %v2940_v20  ;;  %v2705_v20 = vcombine.low %v1432_v12, %v1436_v13  ;;  %v2713_v30 = vcombine.low %v1440_v18, %v1444_v19  ;;  %v211_v12 = vld [vmem:[#allocation6 + $0x78] sm:$0xff] }
 0x119   :  { %2213 = vmatpush1.bf16.msra.mxu1 %v2705_v20 }
 0x11a   :  { %1266 = vmatpush1.bf16.msra.mxu0 %v2938_v21  ;;  %v2968_v21 = vld [vmem:[#allocation8 + $0x260] ss:$8 sps:$4 sm:$0xff]  }
 0x11b   :  { %1267 = vmatprep.subr.bf16.mxu0 %v2943_v22  ;;  %v2714_v22 = vcombine.high %v1440_v18, %v1444_v19  ;;  %v263_v18 = vmul.f32 %v3354_v26, %v211_v12  ;;  %v2995_v19 = vld [vmem:[#allocation8 + $0x2f0] ss:$8 sps:$4 sm:$0xff]  }
 0x11d   :  { %2214 = vmatprep.subr.bf16.mxu1 %v2714_v22 }
 0x11e   :  { %1268 = vmatpush1.bf16.msra.mxu0 %v2941_v24  ;;  %v2973_v24 = vld [vmem:[#allocation8 + $0x274] ss:$8 sps:$4 sm:$0xff]   ;;  %2215 = vmatpush1.bf16.msra.mxu1 %v2713_v30 }
 0x11f   :  { %1269 = vmatprep.subr.bf16.mxu0 %v2946_v28  ;;  %v1452_v28 = vld [vmem:[#allocation11 + $0x1e0] sm:$0xff] }
 0x120   :  { %v2722_v32 = vcombine.high %v1448_v25, %v1452_v28  ;;  %v2721_v36 = vcombine.low %v1448_v25, %v1452_v28  ;;  %v3003_v28 = vld [vmem:[#allocation8 + $0x314] ss:$8 sps:$4 sm:$0xff]  }
 0x122   :  { %1270 = vmatpush1.bf16.msra.mxu0 %v2944_v33  ;;  %v2976_v33 = vld [vmem:[#allocation8 + $0x284] ss:$8 sps:$4 sm:$0xff]   ;;  %2216 = vmatprep.subr.bf16.mxu1 %v2722_v32 }
 0x123   :  { %1271 = vmatprep.subr.bf16.mxu0 %v2949_v34  ;;  %v1456_v34 = vld [vmem:[#allocation11 + $0x200] sm:$0xff]  ;;  %2217 = vmatpush1.bf16.msra.mxu1 %v2721_v36 }
 0x124   :  { %v2730_v38 = vcombine.high %v1456_v34, %v1460_v35  ;;  %v2729_v41 = vcombine.low %v1456_v34, %v1460_v35  ;;  %v3006_v32 = vld [vmem:[#allocation8 + $0x324] ss:$8 sps:$4 sm:$0xff]   ;;  %v3009_v34 = vld [vmem:[#allocation8 + $0x334] ss:$8 sps:$4 sm:$0xff]   ;;  %v3007_v35 = vld [vmem:[#allocation8 + $0x330] ss:$8 sps:$4 sm:$0xff]  }
 0x125   :  { %v3012_v36 = vld [vmem:[#allocation8 + $0x344] ss:$8 sps:$4 sm:$0xff]  }
 0x126   :  { %1272 = vmatpush1.bf16.msra.mxu0 %v2947_v61  ;;  %v2979_v61 = vld [vmem:[#allocation8 + $0x294] ss:$8 sps:$4 sm:$0xff]   ;;  %2218 = vmatprep.subr.bf16.mxu1 %v2730_v38  ;;  %v3018_v38 = vld [vmem:[#allocation8 + $0x364] ss:$8 sps:$4 sm:$0xff]  }
 0x127   :  { %1284 = vmatprep.subr.bf16.mxu0 %v2952_v40  ;;  %v1468_v40 = vld [vmem:[#allocation11 + $0x260] sm:$0xff]  ;;  %2219 = vmatpush1.bf16.msra.mxu1 %v2729_v41 }
 0x128   :  { %v2737_v48 = vcombine.low %v1464_v39, %v1468_v40  ;;  %v3024_v41 = vld [vmem:[#allocation8 + $0x384] ss:$8 sps:$4 sm:$0xff]  }
 0x129   :  { %1274 = vmatmul.mubr.bf16.vlgmr.msra.gmra.mrb[0].mxu0 %v282_v43  ;;  %v2738_v43 = vcombine.high %v1464_v39, %v1468_v40  ;;  %v3021_v39 = vld [vmem:[#allocation8 + $0x374] ss:$8 sps:$4 sm:$0xff]   ;;  %v3019_v40 = vld [vmem:[#allocation8 + $0x370] ss:$8 sps:$4 sm:$0xff]  }
 0x12a   :  { %1285 = vmatpush1.bf16.msra.mxu0 %v2950_v42  ;;  %1316 = vmatprep.mubr.bf16.mxu0 %v285_v46  ;;  %v2977_v42 = vld [vmem:[#allocation8 + $0x290] ss:$8 sps:$4 sm:$0xff]   ;;  %v1472_v46 = vld [vmem:[#allocation11 + $0x280] sm:$0xff] }
 0x12b   :  { %1286 = vmatprep.subr.bf16.mxu0 %v2955_v44  ;;  %v2982_v44 = vld [vmem:[#allocation8 + $0x2a4] ss:$8 sps:$4 sm:$0xff]   ;;  %2220 = vmatprep.subr.bf16.mxu1 %v2738_v43  ;;  %v3027_v43 = vld [vmem:[#allocation8 + $0x394] ss:$8 sps:$4 sm:$0xff]  }
 0x12c   :  { %2221 = vmatpush1.bf16.msra.mxu1 %v2737_v48  ;;  %v3033_v48 = vld [vmem:[#allocation8 + $0x3b4] ss:$8 sps:$4 sm:$0xff]  }
 0x12e   :  { %1287 = vmatpush1.bf16.msra.mxu0 %v2953_v50  ;;  %v2746_v50 = vcombine.high %v1472_v46, %v1476_v47 }
 0x12f   :  { %1288 = vmatprep.subr.bf16.mxu0 %v2958_v55  ;;  %v2745_v55 = vcombine.low %v1472_v46, %v1476_v47  ;;  %v3030_v46 = vld [vmem:[#allocation8 + $0x3a4] ss:$8 sps:$4 sm:$0xff]   ;;  %v3028_v47 = vld [vmem:[#allocation8 + $0x3a0] ss:$8 sps:$4 sm:$0xff]  }
 0x130   :  { %2222 = vmatprep.subr.bf16.mxu1 %v2746_v50  ;;  %v3036_v50 = vld [vmem:[#allocation8 + $0x3c4] ss:$8 sps:$4 sm:$0xff]  }
 0x131   :  { %2223 = vmatpush1.bf16.msra.mxu1 %v2745_v55  ;;  %v194_v55 = vunpack.c.l.bf16 %v3384_v6 }
 0x132   :  { %1289 = vmatpush1.bf16.msra.mxu0 %v2956_v45  ;;  %v1492_v45 = vld [vmem:[#allocation11 + $0x320] sm:$0xff]  ;;  %2224 = vmatprep.subr.bf16.mxu1 %v2754_v57  ;;  %v3398_v57 = vld [vmem:[#allocation6 + $0x70] sm:$0xff] }
 0x133   :  { %1290 = vmatprep.subr.bf16.mxu0 %v2961_v60  ;;  %v2986_v60 = vld [vmem:[#allocation8 + $0x2c0] ss:$8 sps:$4 sm:$0xff]   ;;  %v2762_v63 = vcombine.high %v1488_v29, %v1492_v45 }
 0x135   :  { %2225 = vmatpush1.bf16.msra.mxu1 %v2753_v59  ;;  %v262_v59 = vmul.f32 %v3354_v26, %v3398_v57 }
 0x136   :  { %1291 = vmatpush1.bf16.msra.mxu0 %v2959_v5  ;;  %v1500_v5 = vld [vmem:[#allocation11 + $0x360] sm:$0xff]  ;;  %2226 = vmatprep.subr.bf16.mxu1 %v2762_v63 }
 0x137   :  { %1292 = vmatprep.subr.bf16.mxu0 %v2964_v4  ;;  %v2761_v4 = vcombine.low %v1488_v29, %v1492_v45  ;;  %v2770_v7 = vcombine.high %v1496_v2, %v1500_v5  ;;  %v2769_v13 = vcombine.low %v1496_v2, %v1500_v5  ;;  %v3045_v29 = vld [vmem:[#allocation8 + $0x3f4] ss:$8 sps:$4 sm:$0xff]   ;;  %v238_v45 = vmul.f32 %v3356_v27, %v194_v55  ;;  %v1504_v2 = vld [vmem:[#allocation11 + $0x380] sm:$0xff] }
 0x138   :  { %v1508_v5 = vld [vmem:[#allocation11 + $0x3a0] sm:$0xff] }
 0x139   :  { %2227 = vmatpush1.bf16.msra.mxu1 %v2761_v4  ;;  %v278_v63 = vadd.f32 %v262_v59, %v238_v45  ;;  %v2777_v4 = vcombine.low %v1504_v2, %v1508_v5 }
 0x13a   :  { %1293 = vmatpush1.bf16.msra.mxu0 %v2962_v9  ;;  %v2994_v9 = vld [vmem:[#allocation8 + $0x2e4] ss:$8 sps:$4 sm:$0xff]   ;;  %2228 = vmatprep.subr.bf16.mxu1 %v2770_v7 }
 0x13b   :  { %1294 = vmatprep.subr.bf16.mxu0 %v2967_v11  ;;  %v195_v11 = vunpack.c.h.bf16 %v3384_v6  ;;  %v2778_v6 = vcombine.high %v1504_v2, %v1508_v5  ;;  %v1516_v7 = vld [vmem:[#allocation11 + $0x3e0] sm:$0xff]  ;;  %v1457_v5 = vld [vmem:[#allocation11 + $0x208] sm:$0xff] }
 0x13d   :  { %v239_v23 = vmul.f32 %v3356_v27, %v195_v11  ;;  %2229 = vmatpush1.bf16.msra.mxu1 %v2769_v13  ;;  %v1393_v27 = vld [vmem:[#allocation11 + $0x8] sm:$0xff]  ;;  %v3215_v13 = vmov 2  }
 0x13e   :  { %1295 = vmatpush1.bf16.msra.mxu0 %v2965_v15  ;;  %v2997_v15 = vld [vmem:[#allocation8 + $0x2f4] ss:$8 sps:$4 sm:$0xff]   ;;  %2230 = vmatprep.subr.bf16.mxu1 %v2778_v6  ;;  %v1461_v6 = vld [vmem:[#allocation11 + $0x228] sm:$0xff] }
 0x13f   :  { %1296 = vmatprep.subr.bf16.mxu0 %v2970_v17  ;;  %v260_v17 = vmul.f32 %v3354_v26, %v3387_v10  ;;  %v279_v22 = vadd.f32 %v263_v18, %v239_v23  ;;  %2828 = vset.pattern.permute.xlu0 %v3215_v13  ;;  %v1370_v23 = vld [vmem:[%s3496_s6] sm:$0x3] }
 0x140   :  { %2829 = vset.pattern.permute.xlu1 %v3215_v13 }
 0x141   :  { %v276_v20 = vadd.f32 %v260_v17, %v236_v16  ;;  %v287_v30 = vpack.c.bf16 %v279_v22, %v3370_v62  ;;  %v3013_v62 = vld [vmem:[#allocation8 + $0x350] ss:$8 sps:$4 sm:$0xff]   ;;  %2231 = vmatpush1.bf16.msra.mxu1 %v2777_v4 }
 0x142   :  { %1297 = vmatpush1.bf16.msra.mxu0 %v2968_v21  ;;  %v3000_v21 = vld [vmem:[#allocation8 + $0x304] ss:$8 sps:$4 sm:$0xff]  }
 0x143   :  { %1298 = vmatprep.subr.bf16.mxu0 %v2973_v24  ;;  %v2998_v24 = vld [vmem:[#allocation8 + $0x300] ss:$8 sps:$4 sm:$0xff]   ;;  %v284_v25 = vpack.c.bf16 %v276_v20, %v3368_v54 }
 0x144   :  { %v3010_v54 = vld [vmem:[#allocation8 + $0x340] ss:$8 sps:$4 sm:$0xff]  }
 0x146   :  { %1299 = vmatpush1.bf16.msra.mxu0 %v2971_v31  ;;  %v3001_v31 = vld [vmem:[#allocation8 + $0x310] ss:$8 sps:$4 sm:$0xff]  }
 0x147   :  { %1300 = vmatprep.subr.bf16.mxu0 %v2976_v33  ;;  %v3004_v33 = vld [vmem:[#allocation8 + $0x320] ss:$8 sps:$4 sm:$0xff]  }
 0x14a   :  { %1301 = vmatpush1.bf16.msra.mxu0 %v2974_v37  ;;  %v3015_v37 = vld [vmem:[#allocation8 + $0x354] ss:$8 sps:$4 sm:$0xff]  }
 0x14b   :  { %1302 = vmatprep.subr.bf16.mxu0 %v2979_v61  ;;  %v3016_v61 = vld [vmem:[#allocation8 + $0x360] ss:$8 sps:$4 sm:$0xff]  }
 0x14e   :  { %1303 = vmatpush1.bf16.msra.mxu0 %v2977_v42  ;;  %v3022_v42 = vld [vmem:[#allocation8 + $0x380] ss:$8 sps:$4 sm:$0xff]  }
 0x14f   :  { %1304 = vmatprep.subr.bf16.mxu0 %v2982_v44  ;;  %v3025_v44 = vld [vmem:[#allocation8 + $0x390] ss:$8 sps:$4 sm:$0xff]  }
 0x152   :  { %1305 = vmatpush1.bf16.msra.mxu0 %v2980_v49  ;;  %v3031_v49 = vld [vmem:[#allocation8 + $0x3b0] ss:$8 sps:$4 sm:$0xff]  }
 0x153   :  { %1306 = vmatprep.subr.bf16.mxu0 %v2985_v51  ;;  %v3034_v51 = vld [vmem:[#allocation8 + $0x3c0] ss:$8 sps:$4 sm:$0xff]  }
 0x156   :  { %1307 = vmatpush1.bf16.msra.mxu0 %v2983_v56  ;;  %v3042_v56 = vld [vmem:[#allocation8 + $0x3e4] ss:$8 sps:$4 sm:$0xff]  }
 0x157   :  { %1308 = vmatprep.subr.bf16.mxu0 %v2988_v58  ;;  %v3040_v58 = vld [vmem:[#allocation8 + $0x3e0] ss:$8 sps:$4 sm:$0xff]  }
 0x15a   :  { %1309 = vmatpush1.bf16.msra.mxu0 %v2986_v60  ;;  %v3043_v60 = vld [vmem:[#allocation8 + $0x3f0] ss:$8 sps:$4 sm:$0xff]  }
 0x15b   :  { %1310 = vmatprep.subr.bf16.mxu0 %v2991_v1  ;;  %v286_v1 = vpack.c.bf16 %v278_v63, %v3372_v0  ;;  %v3046_v0 = vld [vmem:[%s3492_s2] sm:$0xff]  ;;  %v1453_v63 = vld [vmem:[#allocation11 + $0x1e8] sm:$0xff] }
 0x15c   :  { %2391 = vperm.xlu0 %2828, %v3046_v0   ;;  %v1481_v0 = vld [vmem:[#allocation11 + $0x2c8] sm:$0xff] }
 0x15e   :  { %1311 = vmatpush1.bf16.msra.mxu0 %v2989_v3  ;;  %v1512_v3 = vld [vmem:[#allocation11 + $0x3c0] sm:$0xff] }
 0x15f   :  { %1312 = vmatprep.subr.bf16.mxu0 %v2994_v9  ;;  %v2786_v8 = vcombine.high %v1512_v3, %v1516_v7  ;;  %v1397_v9 = vld [vmem:[#allocation11 + $0x28] sm:$0xff]  ;;  %v2785_v26 = vcombine.low %v1512_v3, %v1516_v7  ;;  %v2732_v3 = vcombine.high %v1457_v5, %v1461_v6 }
 0x160   :  { %v2667_v11 = vcombine.low %v1393_v27, %v1397_v9  ;;  %v2668_v12 = vcombine.high %v1393_v27, %v1397_v9  ;;  %v1465_v7 = vld [vmem:[#allocation11 + $0x248] sm:$0xff]  ;;  %v2731_v27 = vcombine.low %v1457_v5, %v1461_v6  ;;  %v1446_v5 = vld [vmem:[#allocation11 + $0x1b0] sm:$0xff] }
 0x161   :  { %2232 = vmatprep.subr.bf16.mxu1 %v2786_v8  ;;  %v1469_v8 = vld [vmem:[#allocation11 + $0x268] sm:$0xff] }
 0x162   :  { %1313 = vmatpush1.bf16.msra.mxu0 %v2992_v14  ;;  %2233 = vmatpush1.bf16.msra.mxu1 %v2785_v26  ;;  %v3047_v14 = vld [vmem:[%s3492_s2 + $0x8] sm:$0xff]  ;;  %v2740_v9 = vcombine.high %v1465_v7, %v1469_v8 }
 0x163   :  { %1314 = vmatprep.subr.bf16.mxu0 %v2997_v15  ;;  %2245 = vmatprep.subr.bf16.mxu1 %v2668_v12  ;;  %v1372_v15 = vlaneseq  ;;  %v1473_v26 = vld [vmem:[#allocation11 + $0x288] sm:$0xff]  ;;  %v2739_v12 = vcombine.low %v1465_v7, %v1469_v8  ;;  %v1454_v7 = vld [vmem:[#allocation11 + $0x1f0] sm:$0xff] }
 0x164   :  { %2395 = vperm.xlu1 %2829, %v3047_v14   ;;  %v1485_v14 = vld [vmem:[#allocation11 + $0x2e8] sm:$0xff] }
 0x165   :  { %v3410_v16 = vshrl.u32 %v1372_v15, 7 }
 0x166   :  { %1315 = vmatpush1.bf16.msra.mxu0 %v2995_v19 }
 0x167   :  { %1327 = vmatprep.subr.bf16.mxu0 %v3000_v21  ;;  %v1374_v17 = vsub.s32 0, %v3410_v16  ;;  %v1378_v18 = vsub.s32 1, %v3410_v16 }
 0x169   :  { %1317 = vmatmul.mubr.bf16.vlgmr.msra.gmra.mrb[0].mxu0 %v284_v25  ;;  %v1375_v19 = vrot.slane %v1370_v23, %v1374_v17  ;;  %v1379_v20 = vrot.slane %v1370_v23, %v1378_v18  ;;  %v2756_v23 = vcombine.high %v1481_v0, %v1485_v14 }
 0x16a   :  { %1328 = vmatpush1.bf16.msra.mxu0 %v2998_v24  ;;  %1359 = vmatprep.mubr.bf16.mxu0 %v287_v30 }
 0x16b   :  { %1329 = vmatprep.subr.bf16.mxu0 %v3003_v28 }
 0x16e   :  { %1330 = vmatpush1.bf16.msra.mxu0 %v3001_v31 }
 0x16f   :  { %1331 = vmatprep.subr.bf16.mxu0 %v3006_v32 }
 0x172   :  { %1332 = vmatpush1.bf16.msra.mxu0 %v3004_v33 }
 0x173   :  { %1333 = vmatprep.subr.bf16.mxu0 %v3009_v34 }
 0x176   :  { %1334 = vmatpush1.bf16.msra.mxu0 %v3007_v35 }
 0x177   :  { %1335 = vmatprep.subr.bf16.mxu0 %v3012_v36 }
 0x17a   :  { %1336 = vmatpush1.bf16.msra.mxu0 %v3010_v54  ;;  %v1401_v54 = vld [vmem:[#allocation11 + $0x48] sm:$0xff] }
 0x17b   :  { %1337 = vmatprep.subr.bf16.mxu0 %v3015_v37  ;;  %v1405_v37 = vld [vmem:[#allocation11 + $0x68] sm:$0xff] }
 0x17e   :  { %1338 = vmatpush1.bf16.msra.mxu0 %v3013_v62 }
 0x17f   :  { %1339 = vmatprep.subr.bf16.mxu0 %v3018_v38 }
 0x182   :  { %1340 = vmatpush1.bf16.msra.mxu0 %v3016_v61  ;;  %v2676_v61 = vcombine.high %v1401_v54, %v1405_v37 }
 0x183   :  { %1341 = vmatprep.subr.bf16.mxu0 %v3021_v39  ;;  %v1409_v39 = vld [vmem:[#allocation11 + $0x88] sm:$0xff] }
 0x186   :  { %1342 = vmatpush1.bf16.msra.mxu0 %v3019_v40  ;;  %v1413_v40 = vld [vmem:[#allocation11 + $0xa8] sm:$0xff] }
 0x187   :  { %1343 = vmatprep.subr.bf16.mxu0 %v3024_v41  ;;  %v2675_v41 = vcombine.low %v1401_v54, %v1405_v37 }
 0x18a   :  { %1344 = vmatpush1.bf16.msra.mxu0 %v3022_v42  ;;  %v2684_v42 = vcombine.high %v1409_v39, %v1413_v40 }
 0x18b   :  { %1345 = vmatprep.subr.bf16.mxu0 %v3027_v43  ;;  %v1417_v43 = vld [vmem:[#allocation11 + $0xc8] sm:$0xff] }
 0x18e   :  { %1346 = vmatpush1.bf16.msra.mxu0 %v3025_v44  ;;  %v1421_v44 = vld [vmem:[#allocation11 + $0xe8] sm:$0xff] }
 0x18f   :  { %1347 = vmatprep.subr.bf16.mxu0 %v3030_v46  ;;  %v2683_v46 = vcombine.low %v1409_v39, %v1413_v40  ;;  %v1398_v39 = vld [vmem:[#allocation11 + $0x30] sm:$0xff] }
 0x192   :  { %1348 = vmatpush1.bf16.msra.mxu0 %v3028_v47  ;;  %v2692_v47 = vcombine.high %v1417_v43, %v1421_v44 }
 0x193   :  { %1349 = vmatprep.subr.bf16.mxu0 %v3033_v48  ;;  %v1425_v48 = vld [vmem:[#allocation11 + $0x108] sm:$0xff] }
 0x196   :  { %1350 = vmatpush1.bf16.msra.mxu0 %v3031_v49  ;;  %v1429_v49 = vld [vmem:[#allocation11 + $0x128] sm:$0xff] }
 0x197   :  { %1351 = vmatprep.subr.bf16.mxu0 %v3036_v50  ;;  %v2691_v50 = vcombine.low %v1417_v43, %v1421_v44  ;;  %v2699_v55 = vcombine.low %v1425_v48, %v1429_v49  ;;  %v1406_v43 = vld [vmem:[#allocation11 + $0x70] sm:$0xff] }
 0x19a   :  { %1352 = vmatpush1.bf16.msra.mxu0 %v3034_v51  ;;  %v2700_v51 = vcombine.high %v1425_v48, %v1429_v49  ;;  %v1414_v48 = vld [vmem:[#allocation11 + $0xb0] sm:$0xff] }
 0x19b   :  { %1353 = vmatprep.subr.bf16.mxu0 %v3039_v52  ;;  %v1433_v52 = vld [vmem:[#allocation11 + $0x148] sm:$0xff] }
 0x19e   :  { %1354 = vmatpush1.bf16.msra.mxu0 %v3037_v53  ;;  %v1437_v53 = vld [vmem:[#allocation11 + $0x168] sm:$0xff] }
 0x19f   :  { %1355 = vmatprep.subr.bf16.mxu0 %v3042_v56  ;;  %v2708_v56 = vcombine.high %v1433_v52, %v1437_v53  ;;  %v2707_v45 = vcombine.low %v1433_v52, %v1437_v53  ;;  %v1422_v52 = vld [vmem:[#allocation11 + $0xf0] sm:$0xff] }
 0x1a2   :  { %1356 = vmatpush1.bf16.msra.mxu0 %v3040_v58  ;;  %v1441_v58 = vld [vmem:[#allocation11 + $0x188] sm:$0xff] }
 0x1a3   :  { %1357 = vmatprep.subr.bf16.mxu0 %v3045_v29  ;;  %v1445_v29 = vld [vmem:[#allocation11 + $0x1a8] sm:$0xff] }
 0x1a4   :  { %v2716_v59 = vcombine.high %v1441_v58, %v1445_v29 }
 0x1a6   :  { %1358 = vmatpush1.bf16.msra.mxu0 %v3043_v60  ;;  %v1449_v60 = vld [vmem:[#allocation11 + $0x1c8] sm:$0xff] }
 0x1a7   :  { %v2724_v2 = vcombine.high %v1449_v60, %v1453_v63  ;;  %v2723_v4 = vcombine.low %v1449_v60, %v1453_v63  ;;  %v1438_v60 = vld [vmem:[#allocation11 + $0x170] sm:$0xff] }
 0x1a9   :  { %1360 = vmatmul.mubr.bf16.vlgmr.msra.gmra.mrb[0].mxu0 %v286_v1  ;;  %v2715_v1 = vcombine.low %v1441_v58, %v1445_v29  ;;  %v1430_v58 = vld [vmem:[#allocation11 + $0x130] sm:$0xff] }
 0x27c   :  { %v1361_v21 = vpop.f32.mrb[0].mxu0 }
 0x27d   :  { %v1382_v22 = vadd.f32 %v1375_v19, %v1361_v21  ;;  %v1363_v24 = vpop.f32.mrb[1].mxu0  ;;  %v2755_v21 = vcombine.low %v1481_v0, %v1485_v14  ;;  %v1470_v0 = vld [vmem:[#allocation11 + $0x270] sm:$0xff] }
 0x27e   :  { %v1383_v25 = vadd.f32 %v1379_v20, %v1363_v24  ;;  %v1365_v28 = vpop.f32.mrb[2].mxu0  ;;  %v1497_v24 = vld [vmem:[#allocation11 + $0x348] sm:$0xff] }
 0x27f   :  { %v1384_v30 = vadd.f32 %v1375_v19, %v1365_v28  ;;  %v1367_v31 = vpop.f32.mrb[3].mxu0  ;;  %v1386_v33 = vmax.f32 %v1382_v22, 0.0  ;;  %v1489_v19 = vld [vmem:[#allocation11 + $0x308] sm:$0xff] }
 0x280   :  { %v1385_v32 = vadd.f32 %v1379_v20, %v1367_v31  ;;  %v1387_v35 = vmax.f32 %v1383_v25, 0.0  ;;  %v1493_v20 = vld [vmem:[#allocation11 + $0x328] sm:$0xff] }
 0x281   :  { %v1388_v34 = vmax.f32 %v1384_v30, 0.0  ;;  %v2764_v22 = vcombine.high %v1489_v19, %v1493_v20  ;;  %v1501_v25 = vld [vmem:[#allocation11 + $0x368] sm:$0xff]  ;;  %v2763_v28 = vcombine.low %v1489_v19, %v1493_v20  ;;  %v1478_v19 = vld [vmem:[#allocation11 + $0x2b0] sm:$0xff] }
 0x282   :  { %v1389_v36 = vmax.f32 %v1385_v32, 0.0  ;;  %v2772_v30 = vcombine.high %v1497_v24, %v1501_v25  ;;  %v1505_v31 = vld [vmem:[#allocation11 + $0x388] sm:$0xff] }
 0x283   :  { %v3421_v62 = vpack.c.bf16 %v1388_v34, %v1386_v33  ;;  %v1509_v32 = vld [vmem:[#allocation11 + $0x3a8] sm:$0xff]  ;;  %v2771_v33 = vcombine.low %v1497_v24, %v1501_v25  ;;  %v1486_v24 = vld [vmem:[#allocation11 + $0x2f0] sm:$0xff] }
 0x284   :  { %v3423_v38 = vpack.c.bf16 %v1389_v36, %v1387_v35  ;;  %v2780_v34 = vcombine.high %v1505_v31, %v1509_v32  ;;  %v1513_v35 = vld [vmem:[#allocation11 + $0x3c8] sm:$0xff]  ;;  %v2779_v54 = vcombine.low %v1505_v31, %v1509_v32  ;;  %v1494_v31 = vld [vmem:[#allocation11 + $0x330] sm:$0xff] }
 0x285   :  { %v1517_v36 = vld [vmem:[#allocation11 + $0x3e8] sm:$0xff] }
 0x286   :  { %2234 = vmatprep.mubr.bf16.mxu1 %v3423_v38  ;;  %v2788_v37 = vcombine.high %v1513_v35, %v1517_v36  ;;  %v2787_v40 = vcombine.low %v1513_v35, %v1517_v36  ;;  %v1502_v35 = vld [vmem:[#allocation11 + $0x370] sm:$0xff] }
 0x287   :  { %2235 = vmatmul.mubr.bf16.vlgmr.msra.gmra.mrb[0].mxu1 %v3421_v62 }
 0x288   :  { %2246 = vmatpush1.bf16.msra.mxu1 %v2667_v11  ;;  %2277 = vmatprep.mubr.bf16.mxu1 %v3423_v38  ;;  %v1477_v11 = vld [vmem:[#allocation11 + $0x2a8] sm:$0xff] }
 0x289   :  { %2247 = vmatprep.subr.bf16.mxu1 %v2676_v61  ;;  %v2748_v13 = vcombine.high %v1473_v26, %v1477_v11  ;;  %v2747_v15 = vcombine.low %v1473_v26, %v1477_v11  ;;  %v1394_v61 = vld [vmem:[#allocation11 + $0x10] sm:$0xff] }
 0x28a   :  { %v2669_v44 = vcombine.low %v1394_v61, %v1398_v39  ;;  %v1462_v26 = vld [vmem:[#allocation11 + $0x230] sm:$0xff] }
 0x28c   :  { %2248 = vmatpush1.bf16.msra.mxu1 %v2675_v41  ;;  %v2670_v41 = vcombine.high %v1394_v61, %v1398_v39  ;;  %v1510_v61 = vld [vmem:[#allocation11 + $0x3b0] sm:$0xff] }
 0x28d   :  { %2249 = vmatprep.subr.bf16.mxu1 %v2684_v42  ;;  %v1402_v42 = vld [vmem:[#allocation11 + $0x50] sm:$0xff] }
 0x28e   :  { %v2677_v49 = vcombine.low %v1402_v42, %v1406_v43 }
 0x290   :  { %2250 = vmatpush1.bf16.msra.mxu1 %v2683_v46  ;;  %v2678_v46 = vcombine.high %v1402_v42, %v1406_v43  ;;  %v1518_v42 = vld [vmem:[#allocation11 + $0x3f0] sm:$0xff] }
 0x291   :  { %2251 = vmatprep.subr.bf16.mxu1 %v2692_v47  ;;  %v1410_v47 = vld [vmem:[#allocation11 + $0x90] sm:$0xff] }
 0x292   :  { %v2685_v53 = vcombine.low %v1410_v47, %v1414_v48 }
 0x294   :  { %2252 = vmatpush1.bf16.msra.mxu1 %v2691_v50  ;;  %v2686_v50 = vcombine.high %v1410_v47, %v1414_v48  ;;  %v1399_v47 = vld [vmem:[#allocation11 + $0x38] sm:$0xff] }
 0x295   :  { %2253 = vmatprep.subr.bf16.mxu1 %v2700_v51  ;;  %v1418_v51 = vld [vmem:[#allocation11 + $0xd0] sm:$0xff] }
 0x296   :  { %v2693_v29 = vcombine.low %v1418_v51, %v1422_v52 }
 0x298   :  { %2254 = vmatpush1.bf16.msra.mxu1 %v2699_v55  ;;  %v2694_v55 = vcombine.high %v1418_v51, %v1422_v52  ;;  %v1407_v51 = vld [vmem:[#allocation11 + $0x78] sm:$0xff] }
 0x299   :  { %2255 = vmatprep.subr.bf16.mxu1 %v2708_v56  ;;  %v1426_v56 = vld [vmem:[#allocation11 + $0x110] sm:$0xff] }
 0x29a   :  { %v2701_v63 = vcombine.low %v1426_v56, %v1430_v58 }
 0x29c   :  { %2256 = vmatpush1.bf16.msra.mxu1 %v2707_v45  ;;  %v2702_v45 = vcombine.high %v1426_v56, %v1430_v58  ;;  %v1415_v56 = vld [vmem:[#allocation11 + $0xb8] sm:$0xff] }
 0x29d   :  { %2257 = vmatprep.subr.bf16.mxu1 %v2716_v59  ;;  %v1434_v59 = vld [vmem:[#allocation11 + $0x150] sm:$0xff] }
 0x29e   :  { %v2709_v6 = vcombine.low %v1434_v59, %v1438_v60 }
 0x2a0   :  { %2258 = vmatpush1.bf16.msra.mxu1 %v2715_v1  ;;  %v2710_v1 = vcombine.high %v1434_v59, %v1438_v60  ;;  %v1423_v59 = vld [vmem:[#allocation11 + $0xf8] sm:$0xff] }
 0x2a1   :  { %2259 = vmatprep.subr.bf16.mxu1 %v2724_v2  ;;  %v1442_v2 = vld [vmem:[#allocation11 + $0x190] sm:$0xff] }
 0x2a2   :  { %v2717_v8 = vcombine.low %v1442_v2, %v1446_v5 }
 0x2a4   :  { %2260 = vmatpush1.bf16.msra.mxu1 %v2723_v4  ;;  %v2718_v4 = vcombine.high %v1442_v2, %v1446_v5  ;;  %v1431_v2 = vld [vmem:[#allocation11 + $0x138] sm:$0xff] }
 0x2a5   :  { %2261 = vmatprep.subr.bf16.mxu1 %v2732_v3  ;;  %v1450_v3 = vld [vmem:[#allocation11 + $0x1d0] sm:$0xff] }
 0x2a6   :  { %v2725_v11 = vcombine.low %v1450_v3, %v1454_v7 }
 0x2a8   :  { %2262 = vmatpush1.bf16.msra.mxu1 %v2731_v27  ;;  %v2726_v27 = vcombine.high %v1450_v3, %v1454_v7  ;;  %v1439_v3 = vld [vmem:[#allocation11 + $0x178] sm:$0xff] }
 0x2a9   :  { %2263 = vmatprep.subr.bf16.mxu1 %v2740_v9  ;;  %v1458_v9 = vld [vmem:[#allocation11 + $0x210] sm:$0xff] }
 0x2aa   :  { %v2733_v14 = vcombine.low %v1458_v9, %v1462_v26 }
 0x2ac   :  { %2264 = vmatpush1.bf16.msra.mxu1 %v2739_v12  ;;  %v2734_v12 = vcombine.high %v1458_v9, %v1462_v26 }
 0x2ad   :  { %2265 = vmatprep.subr.bf16.mxu1 %v2748_v13  ;;  %v1466_v13 = vld [vmem:[#allocation11 + $0x250] sm:$0xff] }
 0x2ae   :  { %v2741_v20 = vcombine.low %v1466_v13, %v1470_v0 }
 0x2b0   :  { %2266 = vmatpush1.bf16.msra.mxu1 %v2747_v15  ;;  %v2742_v15 = vcombine.high %v1466_v13, %v1470_v0 }
 0x2b1   :  { %2267 = vmatprep.subr.bf16.mxu1 %v2756_v23  ;;  %v1474_v23 = vld [vmem:[#allocation11 + $0x290] sm:$0xff] }
 0x2b2   :  { %v2749_v25 = vcombine.low %v1474_v23, %v1478_v19 }
 0x2b4   :  { %2268 = vmatpush1.bf16.msra.mxu1 %v2755_v21  ;;  %v2750_v21 = vcombine.high %v1474_v23, %v1478_v19 }
 0x2b5   :  { %2269 = vmatprep.subr.bf16.mxu1 %v2764_v22  ;;  %v1482_v22 = vld [vmem:[#allocation11 + $0x2d0] sm:$0xff] }
 0x2b6   :  { %v2757_v32 = vcombine.low %v1482_v22, %v1486_v24 }
 0x2b8   :  { %2270 = vmatpush1.bf16.msra.mxu1 %v2763_v28  ;;  %v2758_v28 = vcombine.high %v1482_v22, %v1486_v24 }
 0x2b9   :  { %2271 = vmatprep.subr.bf16.mxu1 %v2772_v30  ;;  %v1490_v30 = vld [vmem:[#allocation11 + $0x310] sm:$0xff] }
 0x2ba   :  { %v2765_v36 = vcombine.low %v1490_v30, %v1494_v31 }
 0x2bc   :  { %2272 = vmatpush1.bf16.msra.mxu1 %v2771_v33  ;;  %v2766_v33 = vcombine.high %v1490_v30, %v1494_v31 }
 0x2bd   :  { %2273 = vmatprep.subr.bf16.mxu1 %v2780_v34  ;;  %v1498_v34 = vld [vmem:[#allocation11 + $0x350] sm:$0xff] }
 0x2be   :  { %v2773_v39 = vcombine.low %v1498_v34, %v1502_v35 }
 0x2c0   :  { %2274 = vmatpush1.bf16.msra.mxu1 %v2779_v54  ;;  %v2774_v54 = vcombine.high %v1498_v34, %v1502_v35 }
 0x2c1   :  { %2275 = vmatprep.subr.bf16.mxu1 %v2788_v37  ;;  %v1506_v37 = vld [vmem:[#allocation11 + $0x390] sm:$0xff] }
 0x2c2   :  { %v2781_v43 = vcombine.low %v1506_v37, %v1510_v61 }
 0x2c4   :  { %2276 = vmatpush1.bf16.msra.mxu1 %v2787_v40  ;;  %v2782_v40 = vcombine.high %v1506_v37, %v1510_v61 }
 0x2c5   :  { %2288 = vmatprep.subr.bf16.mxu1 %v2670_v41  ;;  %v1514_v41 = vld [vmem:[#allocation11 + $0x3d0] sm:$0xff] }
 0x2c6   :  { %v2789_v48 = vcombine.low %v1514_v41, %v1518_v42 }
 0x2c7   :  { %2278 = vmatmul.mubr.bf16.vlgmr.msra.gmra.mrb[4].mxu1 %v3421_v62 }
 0x2c8   :  { %2289 = vmatpush1.bf16.msra.mxu1 %v2669_v44  ;;  %2320 = vmatprep.mubr.bf16.mxu1 %v3423_v38  ;;  %v2790_v44 = vcombine.high %v1514_v41, %v1518_v42 }
 0x2c9   :  { %2290 = vmatprep.subr.bf16.mxu1 %v2678_v46  ;;  %v1395_v46 = vld [vmem:[#allocation11 + $0x18] sm:$0xff] }
 0x2ca   :  { %v2671_v52 = vcombine.low %v1395_v46, %v1399_v47 }
 0x2cc   :  { %2291 = vmatpush1.bf16.msra.mxu1 %v2677_v49  ;;  %v2672_v49 = vcombine.high %v1395_v46, %v1399_v47 }
 0x2cd   :  { %2292 = vmatprep.subr.bf16.mxu1 %v2686_v50  ;;  %v1403_v50 = vld [vmem:[#allocation11 + $0x58] sm:$0xff] }
 0x2ce   :  { %v2679_v58 = vcombine.low %v1403_v50, %v1407_v51 }
 0x2d0   :  { %2293 = vmatpush1.bf16.msra.mxu1 %v2685_v53  ;;  %v2680_v53 = vcombine.high %v1403_v50, %v1407_v51 }
 0x2d1   :  { %2294 = vmatprep.subr.bf16.mxu1 %v2694_v55  ;;  %v1411_v55 = vld [vmem:[#allocation11 + $0x98] sm:$0xff] }
 0x2d2   :  { %v2687_v60 = vcombine.low %v1411_v55, %v1415_v56 }
 0x2d4   :  { %2295 = vmatpush1.bf16.msra.mxu1 %v2693_v29  ;;  %v2688_v29 = vcombine.high %v1411_v55, %v1415_v56 }
 0x2d5   :  { %2296 = vmatprep.subr.bf16.mxu1 %v2702_v45  ;;  %v1419_v45 = vld [vmem:[#allocation11 + $0xd8] sm:$0xff] }
 0x2d6   :  { %v2695_v5 = vcombine.low %v1419_v45, %v1423_v59 }
 0x2d8   :  { %2297 = vmatpush1.bf16.msra.mxu1 %v2701_v63  ;;  %v2696_v63 = vcombine.high %v1419_v45, %v1423_v59 }
 0x2d9   :  { %2298 = vmatprep.subr.bf16.mxu1 %v2710_v1  ;;  %v1427_v1 = vld [vmem:[#allocation11 + $0x118] sm:$0xff] }
 0x2da   :  { %v2703_v7 = vcombine.low %v1427_v1, %v1431_v2 }
 0x2dc   :  { %2299 = vmatpush1.bf16.msra.mxu1 %v2709_v6  ;;  %v2704_v6 = vcombine.high %v1427_v1, %v1431_v2 }
 0x2dd   :  { %2300 = vmatprep.subr.bf16.mxu1 %v2718_v4  ;;  %v1435_v4 = vld [vmem:[#allocation11 + $0x158] sm:$0xff] }
 0x2de   :  { %v2711_v9 = vcombine.low %v1435_v4, %v1439_v3 }
 0x2e0   :  { %2301 = vmatpush1.bf16.msra.mxu1 %v2717_v8  ;;  %v1443_v8 = vld [vmem:[#allocation11 + $0x198] sm:$0xff] }
 0x2e1   :  { %2302 = vmatprep.subr.bf16.mxu1 %v2726_v27  ;;  %v1447_v27 = vld [vmem:[#allocation11 + $0x1b8] sm:$0xff] }
 0x2e2   :  { %v2720_v26 = vcombine.high %v1443_v8, %v1447_v27  ;;  %v2719_v13 = vcombine.low %v1443_v8, %v1447_v27  ;;  %v3051_v8 = vld [vmem:[#allocation6 + $0x48] sm:$0xff] }
 0x2e4   :  { %2303 = vmatpush1.bf16.msra.mxu1 %v2725_v11  ;;  %v1451_v11 = vld [vmem:[#allocation11 + $0x1d8] sm:$0xff] }
 0x2e5   :  { %2304 = vmatprep.subr.bf16.mxu1 %v2734_v12  ;;  %v1455_v12 = vld [vmem:[#allocation11 + $0x1f8] sm:$0xff] }
 0x2e6   :  { %v2728_v0 = vcombine.high %v1451_v11, %v1455_v12  ;;  %v2727_v23 = vcombine.low %v1451_v11, %v1455_v12 }
 0x2e8   :  { %2305 = vmatpush1.bf16.msra.mxu1 %v2733_v14  ;;  %v1459_v14 = vld [vmem:[#allocation11 + $0x218] sm:$0xff] }
 0x2e9   :  { %2306 = vmatprep.subr.bf16.mxu1 %v2742_v15  ;;  %v1463_v15 = vld [vmem:[#allocation11 + $0x238] sm:$0xff] }
 0x2ea   :  { %v2736_v19 = vcombine.high %v1459_v14, %v1463_v15  ;;  %v2735_v22 = vcombine.low %v1459_v14, %v1463_v15 }
 0x2ec   :  { %2307 = vmatpush1.bf16.msra.mxu1 %v2741_v20  ;;  %v1467_v20 = vld [vmem:[#allocation11 + $0x258] sm:$0xff] }
 0x2ed   :  { %2308 = vmatprep.subr.bf16.mxu1 %v2750_v21  ;;  %v1471_v21 = vld [vmem:[#allocation11 + $0x278] sm:$0xff] }
 0x2ee   :  { %v2744_v24 = vcombine.high %v1467_v20, %v1471_v21  ;;  %v2743_v30 = vcombine.low %v1467_v20, %v1471_v21  ;;  %v1532_v20 = vsub.s32 2, %v3410_v16  ;;  %v1536_v21 = vsub.s32 3, %v3410_v16 }
 0x2f0   :  { %2309 = vmatpush1.bf16.msra.mxu1 %v2749_v25  ;;  %v1475_v25 = vld [vmem:[#allocation11 + $0x298] sm:$0xff] }
 0x2f1   :  { %2310 = vmatprep.subr.bf16.mxu1 %v2758_v28  ;;  %v1479_v28 = vld [vmem:[#allocation11 + $0x2b8] sm:$0xff] }
 0x2f2   :  { %v2752_v31 = vcombine.high %v1475_v25, %v1479_v28  ;;  %v2751_v34 = vcombine.low %v1475_v25, %v1479_v28 }
 0x2f4   :  { %2311 = vmatpush1.bf16.msra.mxu1 %v2757_v32  ;;  %v1483_v32 = vld [vmem:[#allocation11 + $0x2d8] sm:$0xff] }
 0x2f5   :  { %2312 = vmatprep.subr.bf16.mxu1 %v2766_v33  ;;  %v1487_v33 = vld [vmem:[#allocation11 + $0x2f8] sm:$0xff] }
 0x2f6   :  { %v2760_v35 = vcombine.high %v1483_v32, %v1487_v33  ;;  %v2759_v37 = vcombine.low %v1483_v32, %v1487_v33  ;;  %v3052_v33 = vld [vmem:[#allocation6 + $0x10] sm:$0xff] }
 0x2f8   :  { %2313 = vmatpush1.bf16.msra.mxu1 %v2765_v36  ;;  %v1491_v36 = vld [vmem:[#allocation11 + $0x318] sm:$0xff] }
 0x2f9   :  { %2314 = vmatprep.subr.bf16.mxu1 %v2774_v54  ;;  %v1495_v54 = vld [vmem:[#allocation11 + $0x338] sm:$0xff] }
 0x2fa   :  { %v2768_v61 = vcombine.high %v1491_v36, %v1495_v54  ;;  %v2767_v41 = vcombine.low %v1491_v36, %v1495_v54  ;;  %v3053_v54 = vld [vmem:[#allocation6 + $0x18] sm:$0xff] }
 0x2fc   :  { %2315 = vmatpush1.bf16.msra.mxu1 %v2773_v39  ;;  %v1499_v39 = vld [vmem:[#allocation11 + $0x358] sm:$0xff] }
 0x2fd   :  { %2316 = vmatprep.subr.bf16.mxu1 %v2782_v40  ;;  %v1503_v40 = vld [vmem:[#allocation11 + $0x378] sm:$0xff] }
 0x2fe   :  { %v2776_v42 = vcombine.high %v1499_v39, %v1503_v40  ;;  %v2775_v46 = vcombine.low %v1499_v39, %v1503_v40  ;;  %v3054_v40 = vld [vmem:[#allocation6 + $0x50] sm:$0xff] }
 0x300   :  { %2317 = vmatpush1.bf16.msra.mxu1 %v2781_v43  ;;  %v1507_v43 = vld [vmem:[#allocation11 + $0x398] sm:$0xff] }
 0x301   :  { %2318 = vmatprep.subr.bf16.mxu1 %v2790_v44  ;;  %v1511_v44 = vld [vmem:[#allocation11 + $0x3b8] sm:$0xff] }
 0x302   :  { %v2784_v47 = vcombine.high %v1507_v43, %v1511_v44  ;;  %v2783_v50 = vcombine.low %v1507_v43, %v1511_v44  ;;  %v3055_v43 = vld [vmem:[#allocation6 + $0x58] sm:$0xff] }
 0x304   :  { %2319 = vmatpush1.bf16.msra.mxu1 %v2789_v48  ;;  %v1515_v48 = vld [vmem:[#allocation11 + $0x3d8] sm:$0xff] }
 0x305   :  { %2331 = vmatprep.subr.bf16.mxu1 %v2672_v49  ;;  %v1519_v49 = vld [vmem:[#allocation11 + $0x3f8] sm:$0xff] }
 0x306   :  { %v2792_v51 = vcombine.high %v1515_v48, %v1519_v49 }
 0x307   :  { %2321 = vmatmul.mubr.bf16.vlgmr.msra.gmra.mrb[8].mxu1 %v3421_v62 }
 0x308   :  { %2332 = vmatpush1.bf16.msra.mxu1 %v2671_v52  ;;  %2363 = vmatprep.mubr.bf16.mxu1 %v3423_v38  ;;  %v2712_v38 = vcombine.high %v1435_v4, %v1439_v3  ;;  %v2791_v52 = vcombine.low %v1515_v48, %v1519_v49 }
 0x309   :  { %2333 = vmatprep.subr.bf16.mxu1 %v2680_v53  ;;  %v3436_v53 = vld [vmem:[%s3498_s8] sm:$0xff]  ;;  %s3216_s8 = smov [#allocation12]  }
 0x30a   :  { %v1525_v55 = vrot.slane %v3436_v53, %v1374_v17  ;;  %v1529_v56 = vrot.slane %v3436_v53, %v1378_v18  ;;  %v3050_v17 = vld [vmem:[#allocation6 + $0x40] sm:$0xff]  ;;  %s2498_s0 = sshll.u32 %s3216_s8, 4  ;;  %s2499_s0 = int_to_ptr.vmem [resolvable:$true] %s2498_s0 }
 0x30b   :  { %s3172_s20 = scalar_lea.vmem %s2499_s0, 16  ;;  %s3176_s21 = scalar_lea.vmem %s2499_s0, 32 }
 0x30c   :  { %2334 = vmatpush1.bf16.msra.mxu1 %v2679_v58  ;;  %p3173_p12 = scmp.ne.s32.totalorder %s2499_s0, %s3172_s20  ;;  %p3177_p13 = scmp.lt.s32.totalorder %s2499_s0, %s2499_s0 }
 0x30d   :  { %2335 = vmatprep.subr.bf16.mxu1 %v2688_v29  ;;  %p3178_p0 = scmp.lt.s32.totalorder %s3176_s21, %s3172_s20 }
 0x30f   :  { %p3179_p1 = por %p3178_p0, %p3177_p13 }
 0x310   :  { %2336 = vmatpush1.bf16.msra.mxu1 %v2687_v60 }
 0x311   :  { %2337 = vmatprep.subr.bf16.mxu1 %v2696_v63  ;;  %v3444_v63 = vpop.permute.xlu0 %2391  ;;  %p3180_p2 = pnand %p3179_p1, %p3173_p12 }
 0x314   :  { %2338 = vmatpush1.bf16.msra.mxu1 %v2695_v5 }
 0x315   :  { %2339 = vmatprep.subr.bf16.mxu1 %v2704_v6  ;;  %v3049_v6 = vld [vmem:[#allocation6 + $0x8] sm:$0xff] }
 0x318   :  { %2340 = vmatpush1.bf16.msra.mxu1 %v2703_v7  ;;  %v3446_v7 = vpop.permute.xlu1 %2395 }
 0x319   :  { %2341 = vmatprep.subr.bf16.mxu1 %v2712_v38 }
 0x31c   :  { %2342 = vmatpush1.bf16.msra.mxu1 %v2711_v9 }
 0x31d   :  { %2343 = vmatprep.subr.bf16.mxu1 %v2720_v26 }
 0x320   :  { %2344 = vmatpush1.bf16.msra.mxu1 %v2719_v13 }
 0x321   :  { %2345 = vmatprep.subr.bf16.mxu1 %v2728_v0 }
 0x324   :  { %2346 = vmatpush1.bf16.msra.mxu1 %v2727_v23 }
 0x325   :  { %2347 = vmatprep.subr.bf16.mxu1 %v2736_v19 }
 0x328   :  { %2348 = vmatpush1.bf16.msra.mxu1 %v2735_v22  ;;  %v1533_v22 = vrot.slane %v3436_v53, %v1532_v20 }
 0x329   :  { %2349 = vmatprep.subr.bf16.mxu1 %v2744_v24  ;;  %v1537_v24 = vrot.slane %v3436_v53, %v1536_v21 }
 0x32c   :  { %2350 = vmatpush1.bf16.msra.mxu1 %v2743_v30 }
 0x32d   :  { %2351 = vmatprep.subr.bf16.mxu1 %v2752_v31 }
 0x330   :  { %2352 = vmatpush1.bf16.msra.mxu1 %v2751_v34 }
 0x331   :  { %2353 = vmatprep.subr.bf16.mxu1 %v2760_v35 }
 0x334   :  { %2354 = vmatpush1.bf16.msra.mxu1 %v2759_v37 }
 0x335   :  { %2355 = vmatprep.subr.bf16.mxu1 %v2768_v61 }
 0x338   :  { %2356 = vmatpush1.bf16.msra.mxu1 %v2767_v41 }
 0x339   :  { %2357 = vmatprep.subr.bf16.mxu1 %v2776_v42 }
 0x33c   :  { %2358 = vmatpush1.bf16.msra.mxu1 %v2775_v46 }
 0x33d   :  { %2359 = vmatprep.subr.bf16.mxu1 %v2784_v47 }
 0x340   :  { %2360 = vmatpush1.bf16.msra.mxu1 %v2783_v50 }
 0x341   :  { %2361 = vmatprep.subr.bf16.mxu1 %v2792_v51 }
 0x344   :  { %2362 = vmatpush1.bf16.msra.mxu1 %v2791_v52 }
 0x347   :  { %2364 = vmatmul.mubr.bf16.vlgmr.msra.gmra.mrb[12].mxu1 %v3421_v62  ;;  %v3048_v62 = vld [vmem:[#allocation6] sm:$0xff] }
 0x35a   :  { %v2236_v58 = vpop.f32.mrb[0].mxu1 }
 0x35b   :  { %v2237_v29 = vadd.f32 %v2236_v58, %v1525_v55  ;;  %v2238_v45 = vpop.f32.mrb[1].mxu1 }
 0x35c   :  { %v2239_v59 = vadd.f32 %v2238_v45, %v1529_v56  ;;  %v2240_v60 = vpop.f32.mrb[2].mxu1  ;;  %v1544_v45 = vsub.s32 5, %v3410_v16 }
 0x35d   :  { %v2374_v1 = vsub.f32 %v2237_v29, %v3048_v62  ;;  %v2241_v2 = vadd.f32 %v2240_v60, %v1525_v55  ;;  %v2242_v5 = vpop.f32.mrb[3].mxu1  ;;  %v1540_v29 = vsub.s32 4, %v3410_v16 }
 0x35e   :  { %v2375_v4 = vsub.f32 %v2239_v59, %v3049_v6  ;;  %v2243_v3 = vadd.f32 %v2242_v5, %v1529_v56  ;;  %v1545_v60 = vrot.slane %v3436_v53, %v1544_v45 }
 0x35f   :  { %v2382_v38 = vsub.f32 %v2241_v2, %v3050_v17  ;;  %v2398_v18 = vmul.f32 %v3444_v63, %v2374_v1  ;;  %v1541_v59 = vrot.slane %v3436_v53, %v1540_v29 }
 0x360   :  { %v2383_v27 = vsub.f32 %v2243_v3, %v3051_v8  ;;  %v2399_v9 = vmul.f32 %v3444_v63, %v2375_v4  ;;  %v3056_v4 = vld [vmem:[#allocation6 + $0x20] sm:$0xff] }
 0x361   :  { %v2406_v26 = vmul.f32 %v3446_v7, %v2382_v38  ;;  %v2414_v12 = vmul.f32 %v2398_v18, %v2398_v18  ;;  %v3057_v18 = vld [vmem:[#allocation6 + $0x28] sm:$0xff] }
 0x362   :  { %v2407_v11 = vmul.f32 %v3446_v7, %v2383_v27  ;;  %v2415_v0 = vmul.f32 %v2399_v9, %v2399_v9 }
 0x363   :  { %v2422_v13 = vmul.f32 %v2406_v26, %v2406_v26 }
 0x364   :  { %v2423_v14 = vmul.f32 %v2407_v11, %v2407_v11 }
 0x365   :  { %v2438_v15 = vadd.f32 %v2422_v13, %v2414_v12  ;;  %v3058_v12 = vld [vmem:[#allocation6 + $0x68] sm:$0xff] }
 0x366   :  { %v2439_v23 = vadd.f32 %v2423_v14, %v2415_v0 }
 0x368   :  { %v2473_v19 = vadd.f32 %v2439_v23, %v2438_v15 }
 0x39a   :  { %v2279_v25 = vpop.f32.mrb[4].mxu1 }
 0x39b   :  { %v2280_v28 = vadd.f32 %v2279_v25, %v1533_v22  ;;  %v2281_v30 = vpop.f32.mrb[5].mxu1 }
 0x39c   :  { %v2282_v31 = vadd.f32 %v2281_v30, %v1537_v24  ;;  %v2283_v32 = vpop.f32.mrb[6].mxu1 }
 0x39d   :  { %v2376_v34 = vsub.f32 %v2280_v28, %v3052_v33  ;;  %v2284_v35 = vadd.f32 %v2283_v32, %v1533_v22  ;;  %v2285_v36 = vpop.f32.mrb[7].mxu1  ;;  %v1548_v28 = vsub.s32 6, %v3410_v16 }
 0x39e   :  { %v2377_v37 = vsub.f32 %v2282_v31, %v3053_v54  ;;  %v2286_v61 = vadd.f32 %v2285_v36, %v1537_v24  ;;  %v3059_v54 = vld [vmem:[#allocation6 + $0x30] sm:$0xff] }
 0x39f   :  { %v2400_v39 = vmul.f32 %v3444_v63, %v2376_v34  ;;  %v2384_v41 = vsub.f32 %v2284_v35, %v3054_v40  ;;  %v1549_v30 = vrot.slane %v3436_v53, %v1548_v28  ;;  %v3060_v40 = vld [vmem:[#allocation6 + $0x38] sm:$0xff] }
 0x3a0   :  { %v2401_v42 = vmul.f32 %v3444_v63, %v2377_v37  ;;  %v2385_v44 = vsub.f32 %v2286_v61, %v3055_v43 }
 0x3a1   :  { %v2408_v46 = vmul.f32 %v3446_v7, %v2384_v41  ;;  %v2416_v48 = vmul.f32 %v2400_v39, %v2400_v39 }
 0x3a2   :  { %v2409_v47 = vmul.f32 %v3446_v7, %v2385_v44  ;;  %v2417_v50 = vmul.f32 %v2401_v42, %v2401_v42 }
 0x3a3   :  { %v2424_v49 = vmul.f32 %v2408_v46, %v2408_v46  ;;  %v3061_v46 = vld [vmem:[#allocation6 + $0x78] sm:$0xff] }
 0x3a4   :  { %v2425_v51 = vmul.f32 %v2409_v47, %v2409_v47 }
 0x3a5   :  { %v2440_v52 = vadd.f32 %v2424_v49, %v2416_v48 }
 0x3a6   :  { %v2441_v55 = vadd.f32 %v2425_v51, %v2417_v50 }
 0x3a7   :  { %v2474_v56 = vadd.f32 %v2473_v19, %v2440_v52 }
 0x3a9   :  { %v2475_v58 = vadd.f32 %v2474_v56, %v2441_v55 }
 0x3da   :  { %v2322_v62 = vpop.f32.mrb[8].mxu1 }
 0x3db   :  { %v2323_v1 = vadd.f32 %v2322_v62, %v1541_v59  ;;  %v2324_v2 = vpop.f32.mrb[9].mxu1 }
 0x3dc   :  { %v2325_v5 = vadd.f32 %v2324_v2, %v1545_v60  ;;  %v2326_v6 = vpop.f32.mrb[10].mxu1 }
 0x3dd   :  { %v2378_v3 = vsub.f32 %v2323_v1, %v3056_v4  ;;  %v2327_v17 = vadd.f32 %v2326_v6, %v1541_v59  ;;  %v2328_v38 = vpop.f32.mrb[11].mxu1 }
 0x3de   :  { %v2379_v8 = vsub.f32 %v2325_v5, %v3057_v18  ;;  %v2329_v27 = vadd.f32 %v2328_v38, %v1545_v60 }
 0x3df   :  { %v2402_v9 = vmul.f32 %v3444_v63, %v2378_v3  ;;  %v2386_v26 = vsub.f32 %v2327_v17, %v3387_v10  ;;  %v1552_v10 = vsub.s32 7, %v3410_v16 }
 0x3e0   :  { %v2403_v11 = vmul.f32 %v3444_v63, %v2379_v8  ;;  %v2387_v13 = vsub.f32 %v2329_v27, %v3058_v12 }
 0x3e1   :  { %v2410_v0 = vmul.f32 %v3446_v7, %v2386_v26  ;;  %v2418_v15 = vmul.f32 %v2402_v9, %v2402_v9  ;;  %v1553_v31 = vrot.slane %v3436_v53, %v1552_v10 }
 0x3e2   :  { %v2411_v14 = vmul.f32 %v3446_v7, %v2387_v13  ;;  %v2419_v19 = vmul.f32 %v2403_v11, %v2403_v11 }
 0x3e3   :  { %v2426_v23 = vmul.f32 %v2410_v0, %v2410_v0 }
 0x3e4   :  { %v2427_v20 = vmul.f32 %v2411_v14, %v2411_v14 }
 0x3e5   :  { %v2442_v21 = vadd.f32 %v2426_v23, %v2418_v15 }
 0x3e6   :  { %v2443_v22 = vadd.f32 %v2427_v20, %v2419_v19 }
 0x3e7   :  { %v2476_v24 = vadd.f32 %v2475_v58, %v2442_v21 }
 0x3e9   :  { %v2477_v25 = vadd.f32 %v2476_v24, %v2443_v22 }
 0x41a   :  { %v2365_v32 = vpop.f32.mrb[12].mxu1 }
 0x41b   :  { %v2366_v33 = vadd.f32 %v2365_v32, %v1549_v30  ;;  %v2367_v34 = vpop.f32.mrb[13].mxu1 }
 0x41c   :  { %v2368_v35 = vadd.f32 %v2367_v34, %v1553_v31  ;;  %v2369_v36 = vpop.f32.mrb[14].mxu1 }
 0x41d   :  { %v2380_v37 = vsub.f32 %v2366_v33, %v3059_v54  ;;  %v2370_v61 = vadd.f32 %v2369_v36, %v1549_v30  ;;  %v2371_v39 = vpop.f32.mrb[15].mxu1 }
 0x41e   :  { %v2381_v41 = vsub.f32 %v2368_v35, %v3060_v40  ;;  %v2372_v42 = vadd.f32 %v2371_v39, %v1553_v31 }
 0x41f   :  { %v2404_v43 = vmul.f32 %v3444_v63, %v2380_v37  ;;  %v2388_v16 = vsub.f32 %v2370_v61, %v3398_v57 }
 0x420   :  { %v2405_v44 = vmul.f32 %v3444_v63, %v2381_v41  ;;  %v2389_v53 = vsub.f32 %v2372_v42, %v3061_v46 }
 0x421   :  { %v2412_v47 = vmul.f32 %v3446_v7, %v2388_v16  ;;  %v2420_v49 = vmul.f32 %v2404_v43, %v2404_v43 }
 0x422   :  { %v2413_v48 = vmul.f32 %v3446_v7, %v2389_v53  ;;  %v2421_v51 = vmul.f32 %v2405_v44, %v2405_v44 }
 0x423   :  { %v2428_v50 = vmul.f32 %v2412_v47, %v2412_v47 }
 0x424   :  { %v2429_v52 = vmul.f32 %v2413_v48, %v2413_v48 }
 0x425   :  { %v2444_v55 = vadd.f32 %v2428_v50, %v2420_v49 }
 0x426   :  { %v2445_v56 = vadd.f32 %v2429_v52, %v2421_v51 }
 0x427   :  { %v2478_v58 = vadd.f32 %v2477_v25, %v2444_v55 }
 0x429   :  { %v2479_v29 = vadd.f32 %v2478_v58, %v2445_v56 }
 0x42b   :  { %2480 = vadd.xlane.f32.xlu1 %v2479_v29 }
 0x4b8   :  { %v2481_v45 = vpop.xlane.xlu1 %2480 }
 0x4b9   :  { %v2482_v59 = vrot.slane %v2481_v45, 4 }
 0x4bb   :  { %v2483_v57 = vadd.f32 %v2482_v59, %v2481_v45 }
 0x4bd   :  { %v2484_v60 = vrot.slane %v2483_v57, 2 }
 0x4bf   :  { %v2485_v63 = vadd.f32 %v2484_v60, %v2483_v57 }
 0x4c1   :  { %v2486_v62 = vrot.slane %v2485_v63, 1 }
 0x4c3   :  { %v2487_v1 = vadd.f32 %v2486_v62, %v2485_v63 }
 0x4c5   :  { %2809 = vpush %v2487_v1 }
 0x4f6   :  { %s2810_s26 = spop %2809 }
 0x4f7   :  { %v2489_v7 = vstv %s2810_s26 }
 0x4f8   :  { %2491 = vst.msk [vmem:[#allocation12] sm:$0x1] %vm2490_vm0, %v2489_v7 }
 0x4f9   :  { %3183 = shalt.err (!%p3180_p2)
}
 0x4fa   :  { %s3184_s25 = scalar_lea.hbm %s3499_s9, 16 }
 0x4fb   :  { %p3185_p3 = scmp.ne.s32.totalorder %s3499_s9, %s3184_s25  ;;  %p3188_p4 = scmp.lt.u32.totalorder %s3184_s25, %s3499_s9 }
 0x4fd   :  { %p3190_p5 = pnand %p3188_p4, %p3185_p3 }
 0x4ff   :  { %3193 = shalt.err (!%p3190_p5)
}
 0x500   :  { %2501 = dma.vmem_to_hbm [thread:$0]  %s2499_s0, 16, %s3499_s9, [#allocation5]  }
 0x501   :  { %3200 = dma.done.wait [#allocation5], 16  }
 0x502   :  { %3201 = vsyncadd [#allocation5], 4294967280 }
 0x503   :  { %2505 = vsyncpa [#allocation4], 1 }
 0x504   :  { %2506 = vsyncpa [#allocation7], 1 }
 0x505   :  { %2507 = vsyncpa [#allocation10], 1 }
 0x506   :  { %2508 = vsyncpa [#allocation5], 1 }

</bundles_post_ra>
